<compile_context>
chip_gen: v6e
topology: v6e:2x2x1
jax: 0.10.0
libtpu: 0.0.40
codegen_flags: <defaults>
</compile_context>

<pallas_src>
import functools

import jax
import jax.numpy as jnp
from jax.experimental import pallas as pl
from jax.experimental.pallas import tpu as pltpu

LANE = 128
VMEM_LIMIT = 48 * 1024 * 1024          # <= ~3/4 of v7x's 64 MiB/TC; ample on v5e/v6e
ADJ_TILE_BYTES_TARGET = 2 * 1024 * 1024  # ~2 MiB bf16 adj tile per grid step


def _round_up(a, b):
    return (a + b - 1) // b * b


def padded_num_nodes(n):
    """Node-count padding: multiple of 256 (at most +255 padded rows/cols)."""
    return _round_up(max(n, 256), 256)


def _tiles_for_padded(n_pad):
    """Pick (tm, tk) for the aggregation kernels.

    tm (row block) and tk (reduction tile) both divide n_pad, tk is a multiple
    of tm, and the streamed adj tile (tm x tk bf16) targets ~2 MiB so per-step
    overhead is small relative to the tile's HBM DMA time.
    """
    tm = 512 if n_pad % 512 == 0 else 256
    nk = n_pad // tm
    max_d = max(1, (ADJ_TILE_BYTES_TARGET // (2 * tm)) // tm)
    d = 1
    for cand in range(1, nk + 1):
        if nk % cand == 0 and cand <= max_d:
            d = cand
    return tm, tm * d


# ------------------------------ kernels ----------------------------------- #

def linear_kernel(x_ref, w_ref, out_ref):
    """Feature transform: support1 = x @ W1 (bf16 MXU, f32 acc, bf16 store)."""
    out_ref[...] = jnp.dot(x_ref[...], w_ref[...],
                           preferred_element_type=jnp.float32
                           ).astype(out_ref.dtype)


def aggregate_relu_matmul_kernel(adj_ref, sup_ref, b_ref, w2_ref, out_ref, acc_ref):
    """Layer 1: acc += adj_tile @ support1_tile over k (bf16 MXU, f32 acc);
       finalize h = relu(acc + b1); out = h @ W2 (layer-2 transform fused)."""
    k = pl.program_id(1)

    @pl.when(k == 0)
    def _():
        acc_ref[...] = jnp.zeros_like(acc_ref)

    acc_ref[...] += jnp.dot(adj_ref[...], sup_ref[...],
                            preferred_element_type=jnp.float32)

    @pl.when(k == pl.num_programs(1) - 1)
    def _():
        h = jnp.maximum(acc_ref[...] + b_ref[...], 0.0)
        # TODO(synk): training-mode dropout would use pltpu.prng_seed /
        # pltpu.prng_random_bits here; module runs with training=False (eval).
        out_ref[...] = jnp.dot(h.astype(w2_ref.dtype), w2_ref[...],
                               preferred_element_type=jnp.float32
                               ).astype(out_ref.dtype)


def aggregate_logsoftmax_kernel(adj_ref, sup_ref, b_ref, out_ref, acc_ref, *, n_valid):
    """Layer 2: acc += adj_tile @ support2_tile over k (bf16 MXU, f32 acc);
       finalize out = log_softmax(acc + b2) over the first n_valid class lanes."""
    k = pl.program_id(1)

    @pl.when(k == 0)
    def _():
        acc_ref[...] = jnp.zeros_like(acc_ref)

    acc_ref[...] += jnp.dot(adj_ref[...], sup_ref[...],
                            preferred_element_type=jnp.float32)

    @pl.when(k == pl.num_programs(1) - 1)
    def _():
        z = acc_ref[...] + b_ref[...]
        col = jax.lax.broadcasted_iota(jnp.int32, z.shape, 1)
        z = jnp.where(col < n_valid, z, -jnp.inf)   # mask padded class lanes
        m = jnp.max(z, axis=1, keepdims=True)
        s = z - m
        lse = jnp.log(jnp.sum(jnp.exp(s), axis=1, keepdims=True))
        out_ref[...] = s - lse


# --------------------------- pallas_call wrappers -------------------------- #

def _linear(x_p, w_p, tm):
    n_pad, f_in = x_p.shape
    f_out = w_p.shape[1]
    return pl.pallas_call(
        linear_kernel,
        out_shape=jax.ShapeDtypeStruct((n_pad, f_out), jnp.bfloat16),
        grid_spec=pltpu.PrefetchScalarGridSpec(
            num_scalar_prefetch=0,
            grid=(n_pad // tm,),
            in_specs=[pl.BlockSpec((tm, f_in), lambda i: (i, 0)),
                      pl.BlockSpec((f_in, f_out), lambda i: (0, 0))],
            out_specs=pl.BlockSpec((tm, f_out), lambda i: (i, 0)),
        ),
        compiler_params=pltpu.CompilerParams(
            dimension_semantics=("parallel",),
            vmem_limit_bytes=VMEM_LIMIT,
        ),
    )(x_p, w_p)


def _aggregate(kernel, adj_p, support, bias, extras, out_cols, out_dtype, tm, tk):
    n_pad = adj_p.shape[0]
    acc_cols = support.shape[1]

    in_specs = [
        pl.BlockSpec((tm, tk), lambda i, k: (i, k)),         # adj: streamed bf16 tiles
        pl.BlockSpec((tk, acc_cols), lambda i, k: (k, 0)),   # support: k-blocked bf16
        pl.BlockSpec(bias.shape, lambda i, k: (0, 0)),       # bias: VMEM resident
    ]
    args = [adj_p, support, bias]
    for e in extras:                                         # e.g. W2 (resident)
        in_specs.append(pl.BlockSpec(e.shape, lambda i, k: (0, 0)))
        args.append(e)

    return pl.pallas_call(
        kernel,
        out_shape=jax.ShapeDtypeStruct((n_pad, out_cols), out_dtype),
        grid_spec=pltpu.PrefetchScalarGridSpec(
            num_scalar_prefetch=0,
            grid=(n_pad // tm, n_pad // tk),                 # reduction axis last
            in_specs=in_specs,
            out_specs=pl.BlockSpec((tm, out_cols), lambda i, k: (i, 0)),
            scratch_shapes=[pltpu.VMEM((tm, acc_cols), jnp.float32)],
        ),
        compiler_params=pltpu.CompilerParams(
            dimension_semantics=("parallel", "arbitrary"),
            vmem_limit_bytes=VMEM_LIMIT,
        ),
    )(*args)


# ------------------------------ public API --------------------------------- #

def preprocess_adj(adj):
    """Pad adj to (n_pad, n_pad) and cast to bf16 ONCE per graph.

    Graphs are static across GCN forward passes, so this is hoisted out of the
    jitted forward; cache the result and reuse it for every call.
    (On v5e/v6e an int8 adj with a per-row scale would halve this stream again;
    on v7x the MXU has fp8 but no int8 -- kept bf16 for portability.)
    """
    n = adj.shape[0]
    n_pad = padded_num_nodes(n)
    return jnp.zeros((n_pad, n_pad), jnp.bfloat16).at[:n, :n].set(
        adj.astype(jnp.bfloat16))


@functools.partial(jax.jit, static_argnames=("tm", "tk"))
def _gcn_forward_padded(x, adj_p, w1, b1, w2, b2, *, tm, tk):
    n, nfeat = x.shape
    nhid = w1.shape[1]
    nclass = w2.shape[1]
    n_pad = adj_p.shape[0]

    nfeat_p = _round_up(nfeat, LANE)
    nhid_p = _round_up(nhid, LANE)
    nclass_p = _round_up(nclass, LANE)

    # Feature path and weights in bf16 (native MXU); biases / accumulation f32.
    x_p = jnp.zeros((n_pad, nfeat_p), jnp.bfloat16).at[:n, :nfeat].set(
        x.astype(jnp.bfloat16))
    w1_p = jnp.zeros((nfeat_p, nhid_p), jnp.bfloat16).at[:nfeat, :nhid].set(
        w1.astype(jnp.bfloat16))
    b1_p = jnp.zeros((1, nhid_p), jnp.float32).at[:, :nhid].set(b1.reshape(1, -1))
    w2_p = jnp.zeros((nhid_p, nclass_p), jnp.bfloat16).at[:nhid, :nclass].set(
        w2.astype(jnp.bfloat16))
    b2_p = jnp.zeros((1, nclass_p), jnp.float32).at[:, :nclass].set(b2.reshape(1, -1))

    # support1 = x @ W1                                   (bf16, lane-dense)
    support1 = _linear(x_p, w1_p, tm)
    # support2 = relu(adj @ support1 + b1) @ W2           (layer-1 agg + fused layer-2)
    support2 = _aggregate(aggregate_relu_matmul_kernel, adj_p, support1, b1_p,
                          extras=(w2_p,), out_cols=nclass_p,
                          out_dtype=jnp.bfloat16, tm=tm, tk=tk)
    # out = log_softmax(adj @ support2 + b2)
    out_p = _aggregate(
        functools.partial(aggregate_logsoftmax_kernel, n_valid=nclass),
        adj_p, support2, b2_p, extras=(), out_cols=nclass_p,
        out_dtype=jnp.float32, tm=tm, tk=tk)
    return out_p[:n, :nclass]


def gcn_forward(x, adj_p, w1, b1, w2, b2):
    """Full GCN forward (eval mode). `adj_p` must come from preprocess_adj()."""
    n_pad = adj_p.shape[0]
    tm, tk = _tiles_for_padded(n_pad)
    return _gcn_forward_padded(x, adj_p, w1, b1, w2, b2, tm=tm, tk=tk)


# ------------------------------- references -------------------------------- #

def init_gc_params(key, in_features, out_features):
    """pygcn GraphConvolution.reset_parameters: U(-stdv, stdv), stdv=1/sqrt(out)."""
    stdv = 1.0 / (out_features ** 0.5)
    kw, kb = jax.random.split(key)
    w = jax.random.uniform(kw, (in_features, out_features), jnp.float32, -stdv, stdv)
    b = jax.random.uniform(kb, (out_features,), jnp.float32, -stdv, stdv)
    return w, b


def reference_forward(x, adj, w1, b1, w2, b2):
    """Pure-f32 reference (matches the PyTorch module in eval mode)."""
    h = jax.nn.relu(adj @ (x @ w1) + b1)
    z = adj @ (h @ w2) + b2
    return jax.nn.log_softmax(z, axis=1)


def emulated_reference(x, adj, w1, b1, w2, b2):
    """Reference matching the kernel numerics: bf16 operands, f32 accumulation."""
    bf = lambda a: a.astype(jnp.bfloat16)
    f32 = lambda a: a.astype(jnp.float32)
    adj_f = f32(bf(adj))
    s1 = bf(jnp.dot(f32(bf(x)), f32(bf(w1))))
    h = jax.nn.relu(jnp.dot(adj_f, f32(s1)) + b1)
    s2 = bf(jnp.dot(f32(bf(h)), f32(bf(w2))))
    z = jnp.dot(adj_f, f32(s2)) + b2
    return jax.nn.log_softmax(z, axis=1)


if __name__ == "__main__":
    # Small synthetic shapes consistent with the module.
    N, nfeat, nhid, nclass = 32, 16, 32, 8
    dropout = 0.5  # identity in eval mode

    key = jax.random.PRNGKey(0)
    kx, kadj, k1, k2 = jax.random.split(key, 4)

    x = jax.random.normal(kx, (N, nfeat), jnp.float32)

    # Symmetric, row-normalized dense adjacency with self loops.
    a = (jax.random.uniform(kadj, (N, N)) < 0.2).astype(jnp.float32)
    a = jnp.maximum(a, a.T) + jnp.eye(N, dtype=jnp.float32)
    adj = a / jnp.sum(a, axis=1, keepdims=True)

    w1, b1 = init_gc_params(k1, nfeat, nhid)
    w2, b2 = init_gc_params(k2, nhid, nclass)

    # adj padding + bf16 cast is done once per graph and reused across calls.
    adj_p = preprocess_adj(adj)

    out = gcn_forward(x, adj_p, w1, b1, w2, b2)
    out = jax.block_until_ready(out)
    assert out.shape == (N, nclass)

    ref_q = emulated_reference(x, adj, w1, b1, w2, b2)    # numerics-matched
    ref_f = reference_forward(x, adj, w1, b1, w2, b2)     # pure f32 module semantics
    assert jnp.allclose(out, ref_q, atol=2e-3, rtol=2e-3), float(
        jnp.max(jnp.abs(out - ref_q)))
    assert jnp.allclose(out, ref_f, atol=5e-2, rtol=5e-2), float(
        jnp.max(jnp.abs(out - ref_f)))

    print("KERNEL_OK")
</pallas_src>

<mosaic_0001>
module attributes {stable_mosaic.version = 11 : i64} {
  func.func @linear_kernel(%arg0: i32, %arg1: memref<256x128xbf16, #tpu.memory_space<vmem>>, %arg2: memref<128x128xbf16, #tpu.memory_space<vmem>>, %arg3: memref<256x128xbf16, #tpu.memory_space<vmem>>) attributes {dimension_semantics = [#tpu.dimension_semantics<parallel>], iteration_bounds = array<i64: 1>, scalar_prefetch = 0 : i64, scratch_operands = 0 : i64, tpu.core_type = #tpu.core_type<tc>, window_params = [{transform_indices = @transform_0, window_bounds = array<i64: 256, 128>}, {pipeline_mode = #tpu.pipeline_mode<synchronous>, transform_indices = @transform_1, window_bounds = array<i64: 128, 128>}, {transform_indices = @transform_2, window_bounds = array<i64: 256, 128>}]} {
    %c0 = arith.constant 0 : index
    %c0_0 = arith.constant 0 : index
    %0 = vector.load %arg1[%c0, %c0_0] : memref<256x128xbf16, #tpu.memory_space<vmem>>, vector<256x128xbf16>
    %c0_1 = arith.constant 0 : index
    %c0_2 = arith.constant 0 : index
    %1 = vector.load %arg2[%c0_1, %c0_2] : memref<128x128xbf16, #tpu.memory_space<vmem>>, vector<128x128xbf16>
    %cst = arith.constant dense<0.000000e+00> : vector<256x128xf32>
    %2 = tpu.matmul %0, %1, %cst {dimension_numbers = #tpu.dot_dimension_numbers<[1], [0], [0], [1], [0, 0, 1, 1], [], []>} : vector<256x128xbf16>, vector<128x128xbf16>, vector<256x128xf32> -> vector<256x128xf32>
    %3 = arith.truncf %2 : vector<256x128xf32> to vector<256x128xbf16>
    %c0_3 = arith.constant 0 : index
    %c0_4 = arith.constant 0 : index
    %4 = vector.load %arg3[%c0_3, %c0_4] : memref<256x128xbf16, #tpu.memory_space<vmem>>, vector<256x128xbf16>
    tpu.vector_store %arg3[%c0_3, %c0_4], %3 {strides = array<i32>} : memref<256x128xbf16, #tpu.memory_space<vmem>>, vector<256x128xbf16>,
    return
  }
  func.func @transform_0(%arg0: i32) -> (i32, i32) {
    %c0_i32 = arith.constant 0 : i32
    %c0_i32_0 = arith.constant 0 : i32
    return %arg0, %c0_i32 : i32, i32
  }
  func.func @transform_1(%arg0: i32) -> (i32, i32) {
    %c0_i32 = arith.constant 0 : i32
    %c0_i32_0 = arith.constant 0 : i32
    %c0_i32_1 = arith.constant 0 : i32
    return %c0_i32, %c0_i32_0 : i32, i32
  }
  func.func @transform_2(%arg0: i32) -> (i32, i32) {
    %c0_i32 = arith.constant 0 : i32
    %c0_i32_0 = arith.constant 0 : i32
    return %arg0, %c0_i32 : i32, i32
  }
}

module attributes {stable_mosaic.version = 11 : i64} {
  func.func @aggregate_relu_matmul_kernel(%arg0: i32, %arg1: i32, %arg2: memref<256x256xbf16, #tpu.memory_space<vmem>>, %arg3: memref<256x128xbf16, #tpu.memory_space<vmem>>, %arg4: memref<1x128xf32, #tpu.memory_space<vmem>>, %arg5: memref<128x128xbf16, #tpu.memory_space<vmem>>, %arg6: memref<256x128xbf16, #tpu.memory_space<vmem>>, %arg7: memref<256x128xf32, #tpu.memory_space<vmem>>) attributes {dimension_semantics = [#tpu.dimension_semantics<parallel>, #tpu.dimension_semantics<arbitrary>], iteration_bounds = array<i64: 1, 1>, scalar_prefetch = 0 : i64, scratch_operands = 1 : i64, tpu.core_type = #tpu.core_type<tc>, window_params = [{transform_indices = @transform_0, window_bounds = array<i64: 256, 256>}, {transform_indices = @transform_1, window_bounds = array<i64: 256, 128>}, {pipeline_mode = #tpu.pipeline_mode<synchronous>, transform_indices = @transform_2, window_bounds = array<i64: 1, 128>}, {pipeline_mode = #tpu.pipeline_mode<synchronous>, transform_indices = @transform_3, window_bounds = array<i64: 128, 128>}, {transform_indices = @transform_4, window_bounds = array<i64: 256, 128>}]} {
    %c0_i32 = arith.constant 0 : i32
    %0 = arith.cmpi eq, %arg1, %c0_i32 : i32
    %1 = arith.extui %0 : i1 to i32
    %c0_i32_0 = arith.constant 0 : i32
    %2 = arith.cmpi ne, %1, %c0_i32_0 : i32
    scf.if %2 {
      %cst_10 = arith.constant 0.000000e+00 : f32
      %12 = vector.broadcast %cst_10 : f32 to vector<256x128xf32>
      %c0_11 = arith.constant 0 : index
      %c0_12 = arith.constant 0 : index
      %13 = vector.load %arg7[%c0_11, %c0_12] : memref<256x128xf32, #tpu.memory_space<vmem>>, vector<256x128xf32>
      tpu.vector_store %arg7[%c0_11, %c0_12], %12 {strides = array<i32>} : memref<256x128xf32, #tpu.memory_space<vmem>>, vector<256x128xf32>,
    } else {
    }
    %c0 = arith.constant 0 : index
    %c0_1 = arith.constant 0 : index
    %3 = vector.load %arg7[%c0, %c0_1] : memref<256x128xf32, #tpu.memory_space<vmem>>, vector<256x128xf32>
    %c0_2 = arith.constant 0 : index
    %c0_3 = arith.constant 0 : index
    %4 = vector.load %arg2[%c0_2, %c0_3] : memref<256x256xbf16, #tpu.memory_space<vmem>>, vector<256x256xbf16>
    %c0_4 = arith.constant 0 : index
    %c0_5 = arith.constant 0 : index
    %5 = vector.load %arg3[%c0_4, %c0_5] : memref<256x128xbf16, #tpu.memory_space<vmem>>, vector<256x128xbf16>
    %cst = arith.constant dense<0.000000e+00> : vector<256x128xf32>
    %6 = tpu.matmul %4, %5, %cst {dimension_numbers = #tpu.dot_dimension_numbers<[1], [0], [0], [1], [0, 0, 1, 1], [], []>} : vector<256x256xbf16>, vector<256x128xbf16>, vector<256x128xf32> -> vector<256x128xf32>
    %7 = arith.addf %3, %6 : vector<256x128xf32>
    %c0_6 = arith.constant 0 : index
    %c0_7 = arith.constant 0 : index
    %8 = vector.load %arg7[%c0_6, %c0_7] : memref<256x128xf32, #tpu.memory_space<vmem>>, vector<256x128xf32>
    tpu.vector_store %arg7[%c0_6, %c0_7], %7 {strides = array<i32>} : memref<256x128xf32, #tpu.memory_space<vmem>>, vector<256x128xf32>,
    %c0_i32_8 = arith.constant 0 : i32
    %9 = arith.cmpi eq, %arg1, %c0_i32_8 : i32
    %10 = arith.extui %9 : i1 to i32
    %c0_i32_9 = arith.constant 0 : i32
    %11 = arith.cmpi ne, %10, %c0_i32_9 : i32
    scf.if %11 {
      %c0_10 = arith.constant 0 : index
      %c0_11 = arith.constant 0 : index
      %12 = vector.load %arg7[%c0_10, %c0_11] : memref<256x128xf32, #tpu.memory_space<vmem>>, vector<256x128xf32>
      %c0_12 = arith.constant 0 : index
      %c0_13 = arith.constant 0 : index
      %13 = vector.load %arg4[%c0_12, %c0_13] : memref<1x128xf32, #tpu.memory_space<vmem>>, vector<1x128xf32>
      %14 = vector.broadcast %13 : vector<1x128xf32> to vector<256x128xf32>
      %15 = arith.addf %12, %14 : vector<256x128xf32>
      %cst_14 = arith.constant 0.000000e+00 : f32
      %16 = vector.broadcast %cst_14 : f32 to vector<256x128xf32>
      %17 = arith.maximumf %15, %16 : vector<256x128xf32>
      %18 = arith.truncf %17 : vector<256x128xf32> to vector<256x128xbf16>
      %c0_15 = arith.constant 0 : index
      %c0_16 = arith.constant 0 : index
      %19 = vector.load %arg5[%c0_15, %c0_16] : memref<128x128xbf16, #tpu.memory_space<vmem>>, vector<128x128xbf16>
      %cst_17 = arith.constant dense<0.000000e+00> : vector<256x128xf32>
      %20 = tpu.matmul %18, %19, %cst_17 {dimension_numbers = #tpu.dot_dimension_numbers<[1], [0], [0], [1], [0, 0, 1, 1], [], []>} : vector<256x128xbf16>, vector<128x128xbf16>, vector<256x128xf32> -> vector<256x128xf32>
      %21 = arith.truncf %20 : vector<256x128xf32> to vector<256x128xbf16>
      %c0_18 = arith.constant 0 : index
      %c0_19 = arith.constant 0 : index
      %22 = vector.load %arg6[%c0_18, %c0_19] : memref<256x128xbf16, #tpu.memory_space<vmem>>, vector<256x128xbf16>
      tpu.vector_store %arg6[%c0_18, %c0_19], %21 {strides = array<i32>} : memref<256x128xbf16, #tpu.memory_space<vmem>>, vector<256x128xbf16>,
    } else {
    }
    return
  }
  func.func @transform_0(%arg0: i32, %arg1: i32) -> (i32, i32) {
    %c0_i32 = arith.constant 0 : i32
    return %arg0, %arg1 : i32, i32
  }
  func.func @transform_1(%arg0: i32, %arg1: i32) -> (i32, i32) {
    %c0_i32 = arith.constant 0 : i32
    %c0_i32_0 = arith.constant 0 : i32
    return %arg1, %c0_i32 : i32, i32
  }
  func.func @transform_2(%arg0: i32, %arg1: i32) -> (i32, i32) {
    %c0_i32 = arith.constant 0 : i32
    %c0_i32_0 = arith.constant 0 : i32
    %c0_i32_1 = arith.constant 0 : i32
    return %c0_i32, %c0_i32_0 : i32, i32
  }
  func.func @transform_3(%arg0: i32, %arg1: i32) -> (i32, i32) {
    %c0_i32 = arith.constant 0 : i32
    %c0_i32_0 = arith.constant 0 : i32
    %c0_i32_1 = arith.constant 0 : i32
    return %c0_i32, %c0_i32_0 : i32, i32
  }
  func.func @transform_4(%arg0: i32, %arg1: i32) -> (i32, i32) {
    %c0_i32 = arith.constant 0 : i32
    %c0_i32_0 = arith.constant 0 : i32
    return %arg0, %c0_i32 : i32, i32
  }
}

module attributes {stable_mosaic.version = 11 : i64} {
  func.func @aggregate_logsoftmax_kernel(%arg0: i32, %arg1: i32, %arg2: memref<256x256xbf16, #tpu.memory_space<vmem>>, %arg3: memref<256x128xbf16, #tpu.memory_space<vmem>>, %arg4: memref<1x128xf32, #tpu.memory_space<vmem>>, %arg5: memref<256x128xf32, #tpu.memory_space<vmem>>, %arg6: memref<256x128xf32, #tpu.memory_space<vmem>>) attributes {dimension_semantics = [#tpu.dimension_semantics<parallel>, #tpu.dimension_semantics<arbitrary>], iteration_bounds = array<i64: 1, 1>, scalar_prefetch = 0 : i64, scratch_operands = 1 : i64, tpu.core_type = #tpu.core_type<tc>, window_params = [{transform_indices = @transform_0, window_bounds = array<i64: 256, 256>}, {transform_indices = @transform_1, window_bounds = array<i64: 256, 128>}, {pipeline_mode = #tpu.pipeline_mode<synchronous>, transform_indices = @transform_2, window_bounds = array<i64: 1, 128>}, {transform_indices = @transform_3, window_bounds = array<i64: 256, 128>}]} {
    %c0_i32 = arith.constant 0 : i32
    %0 = arith.cmpi eq, %arg1, %c0_i32 : i32
    %1 = arith.extui %0 : i1 to i32
    %c0_i32_0 = arith.constant 0 : i32
    %2 = arith.cmpi ne, %1, %c0_i32_0 : i32
    scf.if %2 {
      %cst_10 = arith.constant 0.000000e+00 : f32
      %12 = vector.broadcast %cst_10 : f32 to vector<256x128xf32>
      %c0_11 = arith.constant 0 : index
      %c0_12 = arith.constant 0 : index
      %13 = vector.load %arg6[%c0_11, %c0_12] : memref<256x128xf32, #tpu.memory_space<vmem>>, vector<256x128xf32>
      tpu.vector_store %arg6[%c0_11, %c0_12], %12 {strides = array<i32>} : memref<256x128xf32, #tpu.memory_space<vmem>>, vector<256x128xf32>,
    } else {
    }
    %c0 = arith.constant 0 : index
    %c0_1 = arith.constant 0 : index
    %3 = vector.load %arg6[%c0, %c0_1] : memref<256x128xf32, #tpu.memory_space<vmem>>, vector<256x128xf32>
    %c0_2 = arith.constant 0 : index
    %c0_3 = arith.constant 0 : index
    %4 = vector.load %arg2[%c0_2, %c0_3] : memref<256x256xbf16, #tpu.memory_space<vmem>>, vector<256x256xbf16>
    %c0_4 = arith.constant 0 : index
    %c0_5 = arith.constant 0 : index
    %5 = vector.load %arg3[%c0_4, %c0_5] : memref<256x128xbf16, #tpu.memory_space<vmem>>, vector<256x128xbf16>
    %cst = arith.constant dense<0.000000e+00> : vector<256x128xf32>
    %6 = tpu.matmul %4, %5, %cst {dimension_numbers = #tpu.dot_dimension_numbers<[1], [0], [0], [1], [0, 0, 1, 1], [], []>} : vector<256x256xbf16>, vector<256x128xbf16>, vector<256x128xf32> -> vector<256x128xf32>
    %7 = arith.addf %3, %6 : vector<256x128xf32>
    %c0_6 = arith.constant 0 : index
    %c0_7 = arith.constant 0 : index
    %8 = vector.load %arg6[%c0_6, %c0_7] : memref<256x128xf32, #tpu.memory_space<vmem>>, vector<256x128xf32>
    tpu.vector_store %arg6[%c0_6, %c0_7], %7 {strides = array<i32>} : memref<256x128xf32, #tpu.memory_space<vmem>>, vector<256x128xf32>,
    %c0_i32_8 = arith.constant 0 : i32
    %9 = arith.cmpi eq, %arg1, %c0_i32_8 : i32
    %10 = arith.extui %9 : i1 to i32
    %c0_i32_9 = arith.constant 0 : i32
    %11 = arith.cmpi ne, %10, %c0_i32_9 : i32
    scf.if %11 {
      %c0_10 = arith.constant 0 : index
      %c0_11 = arith.constant 0 : index
      %12 = vector.load %arg6[%c0_10, %c0_11] : memref<256x128xf32, #tpu.memory_space<vmem>>, vector<256x128xf32>
      %c0_12 = arith.constant 0 : index
      %c0_13 = arith.constant 0 : index
      %13 = vector.load %arg4[%c0_12, %c0_13] : memref<1x128xf32, #tpu.memory_space<vmem>>, vector<1x128xf32>
      %14 = vector.broadcast %13 : vector<1x128xf32> to vector<256x128xf32>
      %15 = arith.addf %12, %14 : vector<256x128xf32>
      %16 = tpu.iota {dimensions = array<i32: 1>} : vector<256x128xi32>
      %c8_i32 = arith.constant 8 : i32
      %17 = vector.broadcast %c8_i32 : i32 to vector<256x128xi32>
      %18 = arith.cmpi slt, %16, %17 : vector<256x128xi32>
      %cst_14 = arith.constant 0xFF800000 : f32
      %19 = vector.broadcast %cst_14 : f32 to vector<256x128xf32>
      %20 = arith.select %18, %15, %19 : vector<256x128xi1>, vector<256x128xf32>
      %cst_15 = arith.constant dense<0xFF800000> : vector<256xf32>
      %21 = vector.multi_reduction <maximumf>, %20, %cst_15 [1] : vector<256x128xf32> to vector<256xf32>
      %22 = vector.shape_cast %21 : vector<256xf32> to vector<256x1xf32>
      %23 = vector.broadcast %22 : vector<256x1xf32> to vector<256x128xf32>
      %24 = arith.subf %20, %23 : vector<256x128xf32>
      %25 = math.exp %24 : vector<256x128xf32>
      %cst_16 = arith.constant dense<0.000000e+00> : vector<256xf32>
      %26 = vector.multi_reduction <add>, %25, %cst_16 [1] : vector<256x128xf32> to vector<256xf32>
      %27 = vector.shape_cast %26 : vector<256xf32> to vector<256x1xf32>
      %28 = math.log %27 : vector<256x1xf32>
      %29 = vector.broadcast %28 : vector<256x1xf32> to vector<256x128xf32>
      %30 = arith.subf %24, %29 : vector<256x128xf32>
      %c0_17 = arith.constant 0 : index
      %c0_18 = arith.constant 0 : index
      %31 = vector.load %arg5[%c0_17, %c0_18] : memref<256x128xf32, #tpu.memory_space<vmem>>, vector<256x128xf32>
      tpu.vector_store %arg5[%c0_17, %c0_18], %30 {strides = array<i32>} : memref<256x128xf32, #tpu.memory_space<vmem>>, vector<256x128xf32>,
    } else {
    }
    return
  }
  func.func @transform_0(%arg0: i32, %arg1: i32) -> (i32, i32) {
    %c0_i32 = arith.constant 0 : i32
    return %arg0, %arg1 : i32, i32
  }
  func.func @transform_1(%arg0: i32, %arg1: i32) -> (i32, i32) {
    %c0_i32 = arith.constant 0 : i32
    %c0_i32_0 = arith.constant 0 : i32
    return %arg1, %c0_i32 : i32, i32
  }
  func.func @transform_2(%arg0: i32, %arg1: i32) -> (i32, i32) {
    %c0_i32 = arith.constant 0 : i32
    %c0_i32_0 = arith.constant 0 : i32
    %c0_i32_1 = arith.constant 0 : i32
    return %c0_i32, %c0_i32_0 : i32, i32
  }
  func.func @transform_3(%arg0: i32, %arg1: i32) -> (i32, i32) {
    %c0_i32 = arith.constant 0 : i32
    %c0_i32_0 = arith.constant 0 : i32
    return %arg0, %c0_i32 : i32, i32
  }
}

</mosaic_0001>

<bundles_post_ra>
// kernel: _gcn_forward_padded.3
= control target key start
LH: loop header
LB: loop body
LE: loop exit
PB: predicated region body
PF: predicated region fallthrough
CT: control target
= control target key end

     0   :  { %s959_s1 = inlined_call_operand.vmem [shape: bf16[128,128], index: 1, kind: input, shape index: {}]   ;;  %s960_s0 = inlined_call_operand.vmem [shape: bf16[256,128], index: 0, kind: input, shape index: {}]   ;;  %s961_s2 = inlined_call_operand.vmem [shape: bf16[256,128], index: 2, kind: output, shape index: {}]  }
   0x1   :  { %v800_v0 = vld [vmem:[%s959_s1 + $0x38] sm:$0xff]   ;;  %v801_v1 = vld [vmem:[%s959_s1 + $0x30] sm:$0xff]   ;;  %v802_v2 = vld [vmem:[%s959_s1 + $0x28] sm:$0xff]  }
   0x2   :  { %736 = vmatprep.subr.bf16.mxu0 %v800_v0  ;;  %784 = vmatprep.subr.bf16.mxu1 %v800_v0  ;;  %v803_v3 = vld [vmem:[%s959_s1 + $0x20] sm:$0xff]   ;;  %v804_v6 = vld [vmem:[%s959_s1 + $0x18] sm:$0xff]   ;;  %v805_v7 = vld [vmem:[%s959_s1 + $0x10] sm:$0xff]  }
   0x3   :  { %737 = vmatpush3.bf16.msra.mxu0 %v800_v0  ;;  %792 = vmatpush3.bf16.msra.mxu1 %v800_v0  ;;  %v808_v4 = vld [vmem:[%s960_s0] sm:$0xff]   ;;  %v806_v8 = vld [vmem:[%s959_s1 + $0x8] sm:$0xff]   ;;  %v812_v12 = vld [vmem:[%s960_s0 + $0x10] sm:$0xff]  }
   0x4   :  { %738 = vmatprep.subr.bf16.mxu0 %v801_v1  ;;  %785 = vmatprep.subr.bf16.mxu1 %v801_v1  ;;  %v809_v5 = vld [vmem:[%s960_s0 + $0x40] sm:$0xff]   ;;  %v810_v10 = vld [vmem:[%s960_s0 + $0x8] sm:$0xff]   ;;  %v813_v13 = vld [vmem:[%s960_s0 + $0x50] sm:$0xff]  }
   0x5   :  { %752 = vmatprep.mubr.bf16.mxu0 %v808_v4  ;;  %768 = vmatprep.mubr.bf16.mxu1 %v809_v5  ;;  %v807_v9 = vld [vmem:[%s959_s1] sm:$0xff]   ;;  %v811_v11 = vld [vmem:[%s960_s0 + $0x48] sm:$0xff]   ;;  %v814_v14 = vld [vmem:[%s960_s0 + $0x18] sm:$0xff]  }
   0x6   :  { %v815_v15 = vld [vmem:[%s960_s0 + $0x58] sm:$0xff]   ;;  %v816_v16 = vld [vmem:[%s960_s0 + $0x20] sm:$0xff]   ;;  %v818_v18 = vld [vmem:[%s960_s0 + $0x28] sm:$0xff]  }
   0x7   :  { %739 = vmatpush3.bf16.msra.mxu0 %v801_v1  ;;  %793 = vmatpush3.bf16.msra.mxu1 %v801_v1  ;;  %v817_v17 = vld [vmem:[%s960_s0 + $0x60] sm:$0xff]   ;;  %v819_v19 = vld [vmem:[%s960_s0 + $0x68] sm:$0xff]   ;;  %v820_v20 = vld [vmem:[%s960_s0 + $0x30] sm:$0xff]  }
   0x8   :  { %740 = vmatprep.subr.bf16.mxu0 %v802_v2  ;;  %786 = vmatprep.subr.bf16.mxu1 %v802_v2  ;;  %v821_v21 = vld [vmem:[%s960_s0 + $0x70] sm:$0xff]   ;;  %v822_v22 = vld [vmem:[%s960_s0 + $0x38] sm:$0xff]  }
   0x9   :  { %v823_v23 = vld [vmem:[%s960_s0 + $0x78] sm:$0xff]  }
   0xb   :  { %741 = vmatpush3.bf16.msra.mxu0 %v802_v2  ;;  %794 = vmatpush3.bf16.msra.mxu1 %v802_v2 }
   0xc   :  { %742 = vmatprep.subr.bf16.mxu0 %v803_v3  ;;  %787 = vmatprep.subr.bf16.mxu1 %v803_v3 }
   0xf   :  { %743 = vmatpush3.bf16.msra.mxu0 %v803_v3  ;;  %795 = vmatpush3.bf16.msra.mxu1 %v803_v3 }
  0x10   :  { %744 = vmatprep.subr.bf16.mxu0 %v804_v6  ;;  %788 = vmatprep.subr.bf16.mxu1 %v804_v6 }
  0x13   :  { %745 = vmatpush3.bf16.msra.mxu0 %v804_v6  ;;  %796 = vmatpush3.bf16.msra.mxu1 %v804_v6 }
  0x14   :  { %746 = vmatprep.subr.bf16.mxu0 %v805_v7  ;;  %789 = vmatprep.subr.bf16.mxu1 %v805_v7 }
  0x17   :  { %747 = vmatpush3.bf16.msra.mxu0 %v805_v7  ;;  %797 = vmatpush3.bf16.msra.mxu1 %v805_v7 }
  0x18   :  { %748 = vmatprep.subr.bf16.mxu0 %v806_v8  ;;  %790 = vmatprep.subr.bf16.mxu1 %v806_v8 }
  0x1b   :  { %749 = vmatpush3.bf16.msra.mxu0 %v806_v8  ;;  %798 = vmatpush3.bf16.msra.mxu1 %v806_v8 }
  0x1c   :  { %750 = vmatprep.subr.bf16.mxu0 %v807_v9  ;;  %791 = vmatprep.subr.bf16.mxu1 %v807_v9 }
  0x1f   :  { %751 = vmatpush3.bf16.msra.mxu0 %v807_v9  ;;  %799 = vmatpush3.bf16.msra.mxu1 %v807_v9 }
  0x22   :  { %753 = vmatmul.mubr.bf16.vlgmr.msra.gmra.mxu0 %v810_v10  ;;  %769 = vmatmul.mubr.bf16.vlgmr.msra.gmra.mxu1 %v811_v11 }
  0x23   :  { %756 = vmatprep.mubr.bf16.mxu0 %v812_v12  ;;  %772 = vmatprep.mubr.bf16.mxu1 %v813_v13 }
  0x2a   :  { %757 = vmatmul.mubr.bf16.gmra.mxu0 %v814_v14  ;;  %773 = vmatmul.mubr.bf16.gmra.mxu1 %v815_v15 }
  0x2b   :  { %760 = vmatprep.mubr.bf16.mxu0 %v816_v16  ;;  %776 = vmatprep.mubr.bf16.mxu1 %v817_v17 }
  0x32   :  { %761 = vmatmul.mubr.bf16.gmra.mxu0 %v818_v18  ;;  %777 = vmatmul.mubr.bf16.gmra.mxu1 %v819_v19 }
  0x33   :  { %764 = vmatprep.mubr.bf16.mxu0 %v820_v20  ;;  %780 = vmatprep.mubr.bf16.mxu1 %v821_v21 }
  0x3a   :  { %765 = vmatmul.mubr.bf16.gmra.mxu0 %v822_v22  ;;  %781 = vmatmul.mubr.bf16.gmra.mxu1 %v823_v23 }
  0xe2   :  { %v754_v24 = vpop.f32.mrf.mxu0  ;;  %v770_v25 = vpop.f32.mrf.mxu1 }
  0xe4   :  { %v238_v26 = vpop.f32.mrf.mxu0  ;;  %v302_v27 = vpop.f32.mrf.mxu1 }
  0xe6   :  { %v755_v28 = vpop.f32.mrf.mxu0  ;;  %v771_v29 = vpop.f32.mrf.mxu1 }
  0xe7   :  { %v625_v30 = vpack.c.bf16 %v755_v28, %v754_v24  ;;  %v665_v31 = vpack.c.bf16 %v771_v29, %v770_v25 }
  0xe8   :  { %v241_v32 = vpop.f32.mrf.mxu0  ;;  %v305_v33 = vpop.f32.mrf.mxu1 }
  0xe9   :  { %697 = vst [vmem:[%s961_s2 + $0x8] sm:$0xff] %v625_v30   ;;  %705 = vst [vmem:[%s961_s2 + $0x48] sm:$0xff] %v665_v31   ;;  %v620_v34 = vpack.c.bf16 %v241_v32, %v238_v26  ;;  %v660_v35 = vpack.c.bf16 %v305_v33, %v302_v27 }
  0xea   :  { %v758_v36 = vpop.f32.mrf.mxu0  ;;  %v774_v37 = vpop.f32.mrf.mxu1 }
  0xeb   :  { %621 = vst [vmem:[%s961_s2] sm:$0xff] %v620_v34   ;;  %704 = vst [vmem:[%s961_s2 + $0x40] sm:$0xff] %v660_v35  }
  0xec   :  { %v254_v38 = vpop.f32.mrf.mxu0  ;;  %v318_v39 = vpop.f32.mrf.mxu1 }
  0xee   :  { %v759_v40 = vpop.f32.mrf.mxu0  ;;  %v775_v41 = vpop.f32.mrf.mxu1 }
  0xef   :  { %v635_v42 = vpack.c.bf16 %v759_v40, %v758_v36  ;;  %v675_v43 = vpack.c.bf16 %v775_v41, %v774_v37 }
  0xf0   :  { %v257_v44 = vpop.f32.mrf.mxu0  ;;  %v321_v45 = vpop.f32.mrf.mxu1 }
  0xf1   :  { %699 = vst [vmem:[%s961_s2 + $0x18] sm:$0xff] %v635_v42   ;;  %707 = vst [vmem:[%s961_s2 + $0x58] sm:$0xff] %v675_v43   ;;  %v630_v46 = vpack.c.bf16 %v257_v44, %v254_v38  ;;  %v670_v47 = vpack.c.bf16 %v321_v45, %v318_v39 }
  0xf2   :  { %v762_v48 = vpop.f32.mrf.mxu0  ;;  %v778_v49 = vpop.f32.mrf.mxu1 }
  0xf3   :  { %698 = vst [vmem:[%s961_s2 + $0x10] sm:$0xff] %v630_v46   ;;  %706 = vst [vmem:[%s961_s2 + $0x50] sm:$0xff] %v670_v47  }
  0xf4   :  { %v270_v50 = vpop.f32.mrf.mxu0  ;;  %v334_v51 = vpop.f32.mrf.mxu1 }
  0xf6   :  { %v763_v52 = vpop.f32.mrf.mxu0  ;;  %v779_v53 = vpop.f32.mrf.mxu1 }
  0xf7   :  { %v645_v54 = vpack.c.bf16 %v763_v52, %v762_v48  ;;  %v685_v55 = vpack.c.bf16 %v779_v53, %v778_v49 }
  0xf8   :  { %v273_v56 = vpop.f32.mrf.mxu0  ;;  %v337_v57 = vpop.f32.mrf.mxu1 }
  0xf9   :  { %701 = vst [vmem:[%s961_s2 + $0x28] sm:$0xff] %v645_v54   ;;  %709 = vst [vmem:[%s961_s2 + $0x68] sm:$0xff] %v685_v55   ;;  %v640_v58 = vpack.c.bf16 %v273_v56, %v270_v50  ;;  %v680_v59 = vpack.c.bf16 %v337_v57, %v334_v51 }
  0xfa   :  { %v766_v60 = vpop.f32.mrf.mxu0  ;;  %v782_v61 = vpop.f32.mrf.mxu1 }
  0xfb   :  { %700 = vst [vmem:[%s961_s2 + $0x20] sm:$0xff] %v640_v58   ;;  %708 = vst [vmem:[%s961_s2 + $0x60] sm:$0xff] %v680_v59  }
  0xfc   :  { %v286_v62 = vpop.f32.mrf.mxu0  ;;  %v350_v63 = vpop.f32.mrf.mxu1 }
  0xfe   :  { %v767_v0 = vpop.f32.mrf.mxu0  ;;  %v783_v1 = vpop.f32.mrf.mxu1 }
  0xff   :  { %v655_v2 = vpack.c.bf16 %v767_v0, %v766_v60  ;;  %v695_v3 = vpack.c.bf16 %v783_v1, %v782_v61 }
 0x100   :  { %v289_v4 = vpop.f32.mrf.mxu0  ;;  %v353_v5 = vpop.f32.mrf.mxu1 }
 0x101   :  { %703 = vst [vmem:[%s961_s2 + $0x38] sm:$0xff] %v655_v2   ;;  %711 = vst [vmem:[%s961_s2 + $0x78] sm:$0xff] %v695_v3   ;;  %v650_v6 = vpack.c.bf16 %v289_v4, %v286_v62  ;;  %v690_v7 = vpack.c.bf16 %v353_v5, %v350_v63 }
 0x103   :  { %702 = vst [vmem:[%s961_s2 + $0x30] sm:$0xff] %v650_v6   ;;  %710 = vst [vmem:[%s961_s2 + $0x70] sm:$0xff] %v690_v7  }

// kernel: _gcn_forward_padded.5
= control target key start
LH: loop header
LB: loop body
LE: loop exit
PB: predicated region body
PF: predicated region fallthrough
CT: control target
= control target key end

     0   :  { %v702_v48 = vlaneseq  ;;  %s2082_s1 = inlined_call_operand.vmem [shape: bf16[256,128], index: 1, kind: input, shape index: {}]   ;;  %s2083_s0 = inlined_call_operand.vmem [shape: bf16[256,256], index: 0, kind: input, shape index: {}]   ;;  %s2084_s2 = inlined_call_operand.vmem [shape: f32[1,128], index: 2, kind: input, shape index: {}]   ;;  %s2085_s3 = inlined_call_operand.vmem [shape: f32[256,128], index: 3, kind: output, shape index: {}]  }
   0x1   :  { %v1270_v0 = vld [vmem:[%s2082_s1 + $0x78] sm:$0xff]   ;;  %v1272_v2 = vld [vmem:[%s2082_s1 + $0x70] sm:$0xff]   ;;  %v1274_v4 = vld [vmem:[%s2082_s1 + $0x68] sm:$0xff]  }
   0x2   :  { %v1271_v1 = vld [vmem:[%s2082_s1 + $0x38] sm:$0xff]   ;;  %1142 = vmatprep.subr.bf16.mxu0 %v1270_v0  ;;  %1254 = vmatprep.subr.bf16.mxu1 %v1270_v0  ;;  %v1273_v3 = vld [vmem:[%s2082_s1 + $0x30] sm:$0xff]   ;;  %v1275_v5 = vld [vmem:[%s2082_s1 + $0x28] sm:$0xff]   ;;  %v1626_v51 = vand.u32 127, %v702_v48 }
   0x3   :  { %1143 = vmatpush3.bf16.msra.mxu0 %v1271_v1  ;;  %1262 = vmatpush3.bf16.msra.mxu1 %v1271_v1  ;;  %v1276_v6 = vld [vmem:[%s2082_s1 + $0x60] sm:$0xff]   ;;  %v1278_v8 = vld [vmem:[%s2082_s1 + $0x58] sm:$0xff]   ;;  %v1280_v10 = vld [vmem:[%s2082_s1 + $0x50] sm:$0xff]  }
   0x4   :  { %1144 = vmatprep.subr.bf16.mxu0 %v1272_v2  ;;  %1255 = vmatprep.subr.bf16.mxu1 %v1272_v2  ;;  %v1277_v7 = vld [vmem:[%s2082_s1 + $0x20] sm:$0xff]   ;;  %v1279_v9 = vld [vmem:[%s2082_s1 + $0x18] sm:$0xff]   ;;  %v1281_v13 = vld [vmem:[%s2082_s1 + $0x10] sm:$0xff]   ;;  %vm704_vm0 = vcmp.lt.s32.totalorder %v1626_v51, 8 }
   0x5   :  { %v1288_v11 = vld [vmem:[%s2083_s0 + $0x4] ss:$8 sps:$4 sm:$0xff]   ;;  %v1286_v18 = vld [vmem:[%s2083_s0] ss:$8 sps:$4 sm:$0xff]   ;;  %v1292_v20 = vld [vmem:[%s2083_s0 + $0x14] ss:$8 sps:$4 sm:$0xff]  }
   0x6   :  { %v1291_v12 = vld [vmem:[%s2083_s0 + $0x84] ss:$8 sps:$4 sm:$0xff]   ;;  %435 = vmatprep.mubr.bf16.mxu0 %v1288_v11  ;;  %v1289_v19 = vld [vmem:[%s2083_s0 + $0x80] ss:$8 sps:$4 sm:$0xff]   ;;  %v1295_v21 = vld [vmem:[%s2083_s0 + $0x94] ss:$8 sps:$4 sm:$0xff]  }
   0x7   :  { %1145 = vmatpush3.bf16.msra.mxu0 %v1273_v3  ;;  %1263 = vmatpush3.bf16.msra.mxu1 %v1273_v3  ;;  %v1282_v14 = vld [vmem:[%s2082_s1 + $0x48] sm:$0xff]   ;;  %v1284_v16 = vld [vmem:[%s2082_s1 + $0x40] sm:$0xff]   ;;  %v1294_v22 = vld [vmem:[%s2083_s0 + $0x10] ss:$8 sps:$4 sm:$0xff]  }
   0x8   :  { %1146 = vmatprep.subr.bf16.mxu0 %v1274_v4  ;;  %1256 = vmatprep.subr.bf16.mxu1 %v1274_v4  ;;  %v1283_v15 = vld [vmem:[%s2082_s1 + $0x8] sm:$0xff]   ;;  %v1285_v17 = vld [vmem:[%s2082_s1] sm:$0xff]   ;;  %v1297_v23 = vld [vmem:[%s2083_s0 + $0x90] ss:$8 sps:$4 sm:$0xff]  }
   0x9   :  { %499 = vmatprep.mubr.bf16.mxu1 %v1291_v12  ;;  %v1298_v24 = vld [vmem:[%s2083_s0 + $0x24] ss:$8 sps:$4 sm:$0xff]   ;;  %v1300_v26 = vld [vmem:[%s2083_s0 + $0x20] ss:$8 sps:$4 sm:$0xff]   ;;  %v1304_v28 = vld [vmem:[%s2083_s0 + $0x34] ss:$8 sps:$4 sm:$0xff]  }
   0xa   :  { %v1301_v25 = vld [vmem:[%s2083_s0 + $0xa4] ss:$8 sps:$4 sm:$0xff]   ;;  %v1303_v27 = vld [vmem:[%s2083_s0 + $0xa0] ss:$8 sps:$4 sm:$0xff]   ;;  %v1307_v29 = vld [vmem:[%s2083_s0 + $0xb4] ss:$8 sps:$4 sm:$0xff]  }
   0xb   :  { %1147 = vmatpush3.bf16.msra.mxu0 %v1275_v5  ;;  %1264 = vmatpush3.bf16.msra.mxu1 %v1275_v5  ;;  %v1306_v30 = vld [vmem:[%s2083_s0 + $0x30] ss:$8 sps:$4 sm:$0xff]   ;;  %v1310_v32 = vld [vmem:[%s2083_s0 + $0x44] ss:$8 sps:$4 sm:$0xff]   ;;  %v1312_v34 = vld [vmem:[%s2083_s0 + $0x40] ss:$8 sps:$4 sm:$0xff]  }
   0xc   :  { %1148 = vmatprep.subr.bf16.mxu0 %v1276_v6  ;;  %1257 = vmatprep.subr.bf16.mxu1 %v1276_v6  ;;  %v1309_v31 = vld [vmem:[%s2083_s0 + $0xb0] ss:$8 sps:$4 sm:$0xff]   ;;  %v1313_v33 = vld [vmem:[%s2083_s0 + $0xc4] ss:$8 sps:$4 sm:$0xff]   ;;  %v1315_v35 = vld [vmem:[%s2083_s0 + $0xc0] ss:$8 sps:$4 sm:$0xff]  }
   0xd   :  { %v1316_v36 = vld [vmem:[%s2083_s0 + $0x54] ss:$8 sps:$4 sm:$0xff]   ;;  %v1318_v38 = vld [vmem:[%s2083_s0 + $0x50] ss:$8 sps:$4 sm:$0xff]   ;;  %v1322_v40 = vld [vmem:[%s2083_s0 + $0x64] ss:$8 sps:$4 sm:$0xff]  }
   0xe   :  { %v1319_v37 = vld [vmem:[%s2083_s0 + $0xd4] ss:$8 sps:$4 sm:$0xff]   ;;  %v1321_v39 = vld [vmem:[%s2083_s0 + $0xd0] ss:$8 sps:$4 sm:$0xff]   ;;  %v1325_v41 = vld [vmem:[%s2083_s0 + $0xe4] ss:$8 sps:$4 sm:$0xff]  }
   0xf   :  { %1149 = vmatpush3.bf16.msra.mxu0 %v1277_v7  ;;  %1265 = vmatpush3.bf16.msra.mxu1 %v1277_v7  ;;  %v1324_v42 = vld [vmem:[%s2083_s0 + $0x60] ss:$8 sps:$4 sm:$0xff]   ;;  %v1328_v44 = vld [vmem:[%s2083_s0 + $0x74] ss:$8 sps:$4 sm:$0xff]   ;;  %v1330_v46 = vld [vmem:[%s2083_s0 + $0x70] ss:$8 sps:$4 sm:$0xff]  }
  0x10   :  { %1150 = vmatprep.subr.bf16.mxu0 %v1278_v8  ;;  %1258 = vmatprep.subr.bf16.mxu1 %v1278_v8  ;;  %v1327_v43 = vld [vmem:[%s2083_s0 + $0xe0] ss:$8 sps:$4 sm:$0xff]   ;;  %v1331_v45 = vld [vmem:[%s2083_s0 + $0xf4] ss:$8 sps:$4 sm:$0xff]   ;;  %v1333_v47 = vld [vmem:[%s2083_s0 + $0xf0] ss:$8 sps:$4 sm:$0xff]  }
  0x11   :  { %v1631_v54 = vld [vmem:[%s2084_s2] ss:$0 sm:$0xff] }
  0x13   :  { %1151 = vmatpush3.bf16.msra.mxu0 %v1279_v9  ;;  %1266 = vmatpush3.bf16.msra.mxu1 %v1279_v9 }
  0x14   :  { %1152 = vmatprep.subr.bf16.mxu0 %v1280_v10  ;;  %1259 = vmatprep.subr.bf16.mxu1 %v1280_v10 }
  0x17   :  { %1153 = vmatpush3.bf16.msra.mxu0 %v1281_v13  ;;  %1267 = vmatpush3.bf16.msra.mxu1 %v1281_v13 }
  0x18   :  { %1154 = vmatprep.subr.bf16.mxu0 %v1282_v14  ;;  %1260 = vmatprep.subr.bf16.mxu1 %v1282_v14 }
  0x1b   :  { %1155 = vmatpush3.bf16.msra.mxu0 %v1283_v15  ;;  %1268 = vmatpush3.bf16.msra.mxu1 %v1283_v15 }
  0x1c   :  { %1156 = vmatprep.subr.bf16.mxu0 %v1284_v16  ;;  %1261 = vmatprep.subr.bf16.mxu1 %v1284_v16 }
  0x1f   :  { %1157 = vmatpush3.bf16.msra.mxu0 %v1285_v17  ;;  %1269 = vmatpush3.bf16.msra.mxu1 %v1285_v17 }
  0x22   :  { %436 = vmatmul.mubr.bf16.vlgmr.msra.gmra.mxu0 %v1286_v18  ;;  %500 = vmatmul.mubr.bf16.vlgmr.msra.gmra.mxu1 %v1289_v19 }
  0x23   :  { %443 = vmatprep.mubr.bf16.mxu0 %v1292_v20  ;;  %507 = vmatprep.mubr.bf16.mxu1 %v1295_v21 }
  0x2a   :  { %444 = vmatmul.mubr.bf16.gmra.mxu0 %v1294_v22  ;;  %508 = vmatmul.mubr.bf16.gmra.mxu1 %v1297_v23 }
  0x2b   :  { %451 = vmatprep.mubr.bf16.mxu0 %v1298_v24  ;;  %515 = vmatprep.mubr.bf16.mxu1 %v1301_v25 }
  0x32   :  { %452 = vmatmul.mubr.bf16.gmra.mxu0 %v1300_v26  ;;  %516 = vmatmul.mubr.bf16.gmra.mxu1 %v1303_v27 }
  0x33   :  { %459 = vmatprep.mubr.bf16.mxu0 %v1304_v28  ;;  %523 = vmatprep.mubr.bf16.mxu1 %v1307_v29 }
  0x3a   :  { %460 = vmatmul.mubr.bf16.gmra.mxu0 %v1306_v30  ;;  %524 = vmatmul.mubr.bf16.gmra.mxu1 %v1309_v31 }
  0x3b   :  { %467 = vmatprep.mubr.bf16.mxu0 %v1310_v32  ;;  %531 = vmatprep.mubr.bf16.mxu1 %v1313_v33 }
  0x42   :  { %468 = vmatmul.mubr.bf16.gmra.mxu0 %v1312_v34  ;;  %532 = vmatmul.mubr.bf16.gmra.mxu1 %v1315_v35 }
  0x43   :  { %475 = vmatprep.mubr.bf16.mxu0 %v1316_v36  ;;  %539 = vmatprep.mubr.bf16.mxu1 %v1319_v37 }
  0x4a   :  { %476 = vmatmul.mubr.bf16.gmra.mxu0 %v1318_v38  ;;  %540 = vmatmul.mubr.bf16.gmra.mxu1 %v1321_v39 }
  0x4b   :  { %483 = vmatprep.mubr.bf16.mxu0 %v1322_v40  ;;  %547 = vmatprep.mubr.bf16.mxu1 %v1325_v41 }
  0x52   :  { %484 = vmatmul.mubr.bf16.gmra.mxu0 %v1324_v42  ;;  %548 = vmatmul.mubr.bf16.gmra.mxu1 %v1327_v43 }
  0x53   :  { %491 = vmatprep.mubr.bf16.mxu0 %v1328_v44  ;;  %555 = vmatprep.mubr.bf16.mxu1 %v1331_v45 }
  0x5a   :  { %492 = vmatmul.mubr.bf16.gmra.mxu0 %v1330_v46  ;;  %556 = vmatmul.mubr.bf16.gmra.mxu1 %v1333_v47 }
  0xe2   :  { %v1158_v49 = vpop.f32.mrf.mxu0  ;;  %v1206_v50 = vpop.f32.mrf.mxu1 }
  0xe4   :  { %v1159_v52 = vpop.f32.mrf.mxu0  ;;  %v1207_v53 = vpop.f32.mrf.mxu1 }
  0xe5   :  { %v1160_v55 = vadd.f32 %v1159_v52, %v1158_v49  ;;  %v1208_v56 = vadd.f32 %v1207_v53, %v1206_v50 }
  0xe6   :  { %v1161_v57 = vpop.f32.mrf.mxu0  ;;  %v1209_v58 = vpop.f32.mrf.mxu1 }
  0xe7   :  { %v670_v59 = vadd.f32 %v1160_v55, %v1631_v54  ;;  %v686_v62 = vadd.f32 %v1208_v56, %v1631_v54 }
  0xe8   :  { %v1162_v60 = vpop.f32.mrf.mxu0  ;;  %v1210_v61 = vpop.f32.mrf.mxu1 }
  0xe9   :  { %v1163_v63 = vadd.f32 %v1162_v60, %v1161_v57  ;;  %v1211_v0 = vadd.f32 %v1210_v61, %v1209_v58  ;;  %v1638_v1 = vsel %vm704_vm0, %v670_v59, -inf  ;;  %v1644_v7 = vsel %vm704_vm0, %v686_v62, -inf }
  0xea   :  { %v1164_v2 = vpop.f32.mrf.mxu0  ;;  %737 = vmax.xlane.f32.xlu0 %v1638_v1  ;;  %v1212_v3 = vpop.f32.mrf.mxu1 }
  0xeb   :  { %v687_v4 = vadd.f32 %v1211_v0, %v1631_v54  ;;  %v671_v11 = vadd.f32 %v1163_v63, %v1631_v54 }
  0xec   :  { %v1165_v5 = vpop.f32.mrf.mxu0  ;;  %v1213_v6 = vpop.f32.mrf.mxu1 }
  0xed   :  { %v1166_v8 = vadd.f32 %v1165_v5, %v1164_v2  ;;  %v1214_v9 = vadd.f32 %v1213_v6, %v1212_v3  ;;  %v1648_v10 = vsel %vm704_vm0, %v687_v4, -inf  ;;  %v1661_v21 = vsel %vm704_vm0, %v671_v11, -inf }
  0xee   :  { %771 = vmax.xlane.f32.xlu1 %v1648_v10  ;;  %v1167_v12 = vpop.f32.mrf.mxu0  ;;  %769 = vmax.xlane.f32.xlu0 %v1644_v7  ;;  %v1215_v13 = vpop.f32.mrf.mxu1 }
  0xef   :  { %v672_v14 = vadd.f32 %v1166_v8, %v1631_v54  ;;  %v688_v15 = vadd.f32 %v1214_v9, %v1631_v54 }
  0xf0   :  { %v1168_v16 = vpop.f32.mrf.mxu0  ;;  %v1216_v17 = vpop.f32.mrf.mxu1 }
  0xf1   :  { %v1169_v18 = vadd.f32 %v1168_v16, %v1167_v12  ;;  %v1217_v19 = vadd.f32 %v1216_v17, %v1215_v13  ;;  %v1657_v20 = vsel %vm704_vm0, %v672_v14, -inf  ;;  %v1668_v25 = vsel %vm704_vm0, %v688_v15, -inf }
  0xf2   :  { %v1170_v22 = vpop.f32.mrf.mxu0  ;;  %741 = vmax.xlane.f32.xlu1 %v1657_v20  ;;  %739 = vmax.xlane.f32.xlu0 %v1661_v21  ;;  %v1218_v23 = vpop.f32.mrf.mxu1 }
  0xf3   :  { %v673_v24 = vadd.f32 %v1169_v18, %v1631_v54  ;;  %v689_v31 = vadd.f32 %v1217_v19, %v1631_v54 }
  0xf4   :  { %v1171_v26 = vpop.f32.mrf.mxu0  ;;  %v1219_v27 = vpop.f32.mrf.mxu1 }
  0xf5   :  { %v1172_v28 = vadd.f32 %v1171_v26, %v1170_v22  ;;  %v1220_v29 = vadd.f32 %v1219_v27, %v1218_v23  ;;  %v1672_v30 = vsel %vm704_vm0, %v673_v24, -inf  ;;  %v1681_v40 = vsel %vm704_vm0, %v689_v31, -inf }
  0xf6   :  { %v1173_v32 = vpop.f32.mrf.mxu0  ;;  %743 = vmax.xlane.f32.xlu1 %v1672_v30  ;;  %773 = vmax.xlane.f32.xlu0 %v1668_v25  ;;  %v1221_v33 = vpop.f32.mrf.mxu1 }
  0xf7   :  { %v674_v34 = vadd.f32 %v1172_v28, %v1631_v54  ;;  %v690_v35 = vadd.f32 %v1220_v29, %v1631_v54 }
  0xf8   :  { %v1174_v36 = vpop.f32.mrf.mxu0  ;;  %v1222_v37 = vpop.f32.mrf.mxu1 }
  0xf9   :  { %v1175_v38 = vadd.f32 %v1174_v36, %v1173_v32  ;;  %v1223_v39 = vadd.f32 %v1222_v37, %v1221_v33  ;;  %v1685_v41 = vsel %vm704_vm0, %v674_v34, -inf  ;;  %v1692_v45 = vsel %vm704_vm0, %v690_v35, -inf }
  0xfa   :  { %v1176_v42 = vpop.f32.mrf.mxu0  ;;  %775 = vmax.xlane.f32.xlu1 %v1681_v40  ;;  %745 = vmax.xlane.f32.xlu0 %v1685_v41  ;;  %v1224_v43 = vpop.f32.mrf.mxu1 }
  0xfb   :  { %v675_v44 = vadd.f32 %v1175_v38, %v1631_v54  ;;  %v691_v52 = vadd.f32 %v1223_v39, %v1631_v54 }
  0xfc   :  { %v1177_v46 = vpop.f32.mrf.mxu0  ;;  %v1225_v47 = vpop.f32.mrf.mxu1 }
  0xfd   :  { %v1178_v48 = vadd.f32 %v1177_v46, %v1176_v42  ;;  %v1226_v49 = vadd.f32 %v1225_v47, %v1224_v43  ;;  %v1696_v50 = vsel %vm704_vm0, %v675_v44, -inf  ;;  %v1705_v62 = vsel %vm704_vm0, %v691_v52, -inf }
  0xfe   :  { %v1179_v53 = vpop.f32.mrf.mxu0  ;;  %747 = vmax.xlane.f32.xlu1 %v1696_v50  ;;  %777 = vmax.xlane.f32.xlu0 %v1692_v45  ;;  %v1227_v55 = vpop.f32.mrf.mxu1 }
  0xff   :  { %v676_v56 = vadd.f32 %v1178_v48, %v1631_v54  ;;  %v692_v57 = vadd.f32 %v1226_v49, %v1631_v54 }
 0x100   :  { %v1180_v58 = vpop.f32.mrf.mxu0  ;;  %v1228_v59 = vpop.f32.mrf.mxu1 }
 0x101   :  { %v1181_v60 = vadd.f32 %v1180_v58, %v1179_v53  ;;  %v1229_v61 = vadd.f32 %v1228_v59, %v1227_v55  ;;  %v1709_v63 = vsel %vm704_vm0, %v676_v56, -inf  ;;  %v1716_v4 = vsel %vm704_vm0, %v692_v57, -inf }
 0x102   :  { %v1182_v0 = vpop.f32.mrf.mxu0  ;;  %779 = vmax.xlane.f32.xlu1 %v1705_v62  ;;  %749 = vmax.xlane.f32.xlu0 %v1709_v63  ;;  %v1230_v2 = vpop.f32.mrf.mxu1 }
 0x103   :  { %v677_v3 = vadd.f32 %v1181_v60, %v1631_v54  ;;  %v693_v12 = vadd.f32 %v1229_v61, %v1631_v54 }
 0x104   :  { %v1183_v5 = vpop.f32.mrf.mxu0  ;;  %v1231_v6 = vpop.f32.mrf.mxu1 }
 0x105   :  { %v1184_v8 = vadd.f32 %v1183_v5, %v1182_v0  ;;  %v1232_v9 = vadd.f32 %v1231_v6, %v1230_v2  ;;  %v1720_v11 = vsel %vm704_vm0, %v677_v3, -inf  ;;  %v1729_v23 = vsel %vm704_vm0, %v693_v12, -inf }
 0x106   :  { %v1185_v13 = vpop.f32.mrf.mxu0  ;;  %751 = vmax.xlane.f32.xlu1 %v1720_v11  ;;  %781 = vmax.xlane.f32.xlu0 %v1716_v4  ;;  %v1233_v14 = vpop.f32.mrf.mxu1 }
 0x107   :  { %v678_v15 = vadd.f32 %v1184_v8, %v1631_v54  ;;  %v694_v16 = vadd.f32 %v1232_v9, %v1631_v54 }
 0x108   :  { %v1186_v17 = vpop.f32.mrf.mxu0  ;;  %v1234_v18 = vpop.f32.mrf.mxu1 }
 0x109   :  { %v1187_v19 = vadd.f32 %v1186_v17, %v1185_v13  ;;  %v1235_v22 = vadd.f32 %v1234_v18, %v1233_v14  ;;  %v1733_v24 = vsel %vm704_vm0, %v678_v15, -inf  ;;  %v1740_v29 = vsel %vm704_vm0, %v694_v16, -inf }
 0x10a   :  { %v1188_v26 = vpop.f32.mrf.mxu0  ;;  %783 = vmax.xlane.f32.xlu1 %v1729_v23  ;;  %753 = vmax.xlane.f32.xlu0 %v1733_v24  ;;  %v1236_v27 = vpop.f32.mrf.mxu1 }
 0x10b   :  { %v679_v28 = vadd.f32 %v1187_v19, %v1631_v54  ;;  %v695_v36 = vadd.f32 %v1235_v22, %v1631_v54 }
 0x10c   :  { %v1189_v31 = vpop.f32.mrf.mxu0  ;;  %v1237_v32 = vpop.f32.mrf.mxu1 }
 0x10d   :  { %v1190_v33 = vadd.f32 %v1189_v31, %v1188_v26  ;;  %v1238_v34 = vadd.f32 %v1237_v32, %v1236_v27  ;;  %v1744_v35 = vsel %vm704_vm0, %v679_v28, -inf  ;;  %v1753_v48 = vsel %vm704_vm0, %v695_v36, -inf }
 0x10e   :  { %v1191_v37 = vpop.f32.mrf.mxu0  ;;  %755 = vmax.xlane.f32.xlu1 %v1744_v35  ;;  %785 = vmax.xlane.f32.xlu0 %v1740_v29  ;;  %v1239_v38 = vpop.f32.mrf.mxu1 }
 0x10f   :  { %v680_v39 = vadd.f32 %v1190_v33, %v1631_v54  ;;  %v696_v42 = vadd.f32 %v1238_v34, %v1631_v54 }
 0x110   :  { %v1192_v43 = vpop.f32.mrf.mxu0  ;;  %v1240_v44 = vpop.f32.mrf.mxu1 }
 0x111   :  { %v1193_v46 = vadd.f32 %v1192_v43, %v1191_v37  ;;  %v1241_v47 = vadd.f32 %v1240_v44, %v1239_v38  ;;  %v1757_v49 = vsel %vm704_vm0, %v680_v39, -inf  ;;  %v1764_v56 = vsel %vm704_vm0, %v696_v42, -inf }
 0x112   :  { %v1194_v52 = vpop.f32.mrf.mxu0  ;;  %787 = vmax.xlane.f32.xlu1 %v1753_v48  ;;  %757 = vmax.xlane.f32.xlu0 %v1757_v49  ;;  %v1242_v53 = vpop.f32.mrf.mxu1 }
 0x113   :  { %v681_v55 = vadd.f32 %v1193_v46, %v1631_v54  ;;  %v697_v0 = vadd.f32 %v1241_v47, %v1631_v54 }
 0x114   :  { %v1195_v57 = vpop.f32.mrf.mxu0  ;;  %v1243_v58 = vpop.f32.mrf.mxu1 }
 0x115   :  { %v1196_v59 = vadd.f32 %v1195_v57, %v1194_v52  ;;  %v1244_v60 = vadd.f32 %v1243_v58, %v1242_v53  ;;  %v1768_v61 = vsel %vm704_vm0, %v681_v55, -inf  ;;  %v1777_v14 = vsel %vm704_vm0, %v697_v0, -inf }
 0x116   :  { %v1197_v2 = vpop.f32.mrf.mxu0  ;;  %759 = vmax.xlane.f32.xlu1 %v1768_v61  ;;  %789 = vmax.xlane.f32.xlu0 %v1764_v56  ;;  %v1245_v3 = vpop.f32.mrf.mxu1 }
 0x117   :  { %v682_v5 = vadd.f32 %v1196_v59, %v1631_v54  ;;  %v698_v6 = vadd.f32 %v1244_v60, %v1631_v54 }
 0x118   :  { %v1198_v8 = vpop.f32.mrf.mxu0  ;;  %v1246_v9 = vpop.f32.mrf.mxu1 }
 0x119   :  { %v1199_v12 = vadd.f32 %v1198_v8, %v1197_v2  ;;  %v1247_v13 = vadd.f32 %v1246_v9, %v1245_v3  ;;  %v1781_v15 = vsel %vm704_vm0, %v682_v5, -inf  ;;  %v1788_v19 = vsel %vm704_vm0, %v698_v6, -inf }
 0x11a   :  { %v1200_v16 = vpop.f32.mrf.mxu0  ;;  %791 = vmax.xlane.f32.xlu1 %v1777_v14  ;;  %761 = vmax.xlane.f32.xlu0 %v1781_v15  ;;  %v1248_v17 = vpop.f32.mrf.mxu1 }
 0x11b   :  { %v683_v18 = vadd.f32 %v1199_v12, %v1631_v54  ;;  %v699_v32 = vadd.f32 %v1247_v13, %v1631_v54 }
 0x11c   :  { %v1201_v22 = vpop.f32.mrf.mxu0  ;;  %v1249_v26 = vpop.f32.mrf.mxu1 }
 0x11d   :  { %v1202_v27 = vadd.f32 %v1201_v22, %v1200_v16  ;;  %v1250_v28 = vadd.f32 %v1249_v26, %v1248_v17  ;;  %v1792_v31 = vsel %vm704_vm0, %v683_v18, -inf  ;;  %v1801_v44 = vsel %vm704_vm0, %v699_v32, -inf }
 0x11e   :  { %v1203_v33 = vpop.f32.mrf.mxu0  ;;  %763 = vmax.xlane.f32.xlu1 %v1792_v31  ;;  %793 = vmax.xlane.f32.xlu0 %v1788_v19  ;;  %v1251_v34 = vpop.f32.mrf.mxu1 }
 0x11f   :  { %v684_v36 = vadd.f32 %v1202_v27, %v1631_v54  ;;  %v700_v37 = vadd.f32 %v1250_v28, %v1631_v54 }
 0x120   :  { %v1204_v38 = vpop.f32.mrf.mxu0  ;;  %v1252_v39 = vpop.f32.mrf.mxu1 }
 0x121   :  { %v1205_v42 = vadd.f32 %v1204_v38, %v1203_v33  ;;  %v1253_v43 = vadd.f32 %v1252_v39, %v1251_v34  ;;  %v1805_v46 = vsel %vm704_vm0, %v684_v36, -inf  ;;  %v1812_v52 = vsel %vm704_vm0, %v700_v37, -inf }
 0x122   :  { %795 = vmax.xlane.f32.xlu1 %v1801_v44  ;;  %765 = vmax.xlane.f32.xlu0 %v1805_v46 }
 0x123   :  { %v685_v47 = vadd.f32 %v1205_v42, %v1631_v54  ;;  %v701_v53 = vadd.f32 %v1253_v43, %v1631_v54 }
 0x125   :  { %v1817_v55 = vsel %vm704_vm0, %v685_v47, -inf  ;;  %v1821_v57 = vsel %vm704_vm0, %v701_v53, -inf }
 0x126   :  { %767 = vmax.xlane.f32.xlu1 %v1817_v55  ;;  %797 = vmax.xlane.f32.xlu0 %v1812_v52 }
 0x12a   :  { %799 = vmax.xlane.f32.xlu1 %v1821_v57 }
 0x173   :  { %v738_v58 = vpop.xlane.xlu0 %737 }
 0x174   :  { %v1827_v59 = vsub.f32 %v1638_v1, %v738_v58 }
 0x176   :  { %v833_v54 = vmul.f32 1.442695, %v1827_v59 }
 0x177   :  { %v772_v60 = vpop.xlane.xlu1 %771  ;;  %v770_v0 = vpop.xlane.xlu0 %769 }
 0x178   :  { %1334 = vpow2.f32 %v833_v54  ;;  %v1831_v2 = vsub.f32 %v1644_v7, %v770_v0  ;;  %v1835_v6 = vsub.f32 %v1648_v10, %v772_v60 }
 0x17a   :  { %v865_v51 = vmul.f32 1.442695, %v1831_v2  ;;  %v867_v16 = vmul.f32 1.442695, %v1835_v6 }
 0x17b   :  { %v742_v3 = vpop.xlane.xlu1 %741  ;;  %v740_v5 = vpop.xlane.xlu0 %739 }
 0x17c   :  { %v1838_v8 = vsub.f32 %v1657_v20, %v742_v3  ;;  %v1841_v1 = vsub.f32 %v1661_v21, %v740_v5  ;;  %1336 = vpow2.f32 %v865_v51 }
 0x17e   :  { %v837_v9 = vmul.f32 1.442695, %v1838_v8  ;;  %v835_v12 = vmul.f32 1.442695, %v1841_v1 }
 0x17f   :  { %v744_v7 = vpop.xlane.xlu1 %743  ;;  %v774_v13 = vpop.xlane.xlu0 %773 }
 0x180   :  { %1338 = vpow2.f32 %v837_v9  ;;  %v1847_v17 = vsub.f32 %v1672_v30, %v744_v7  ;;  %v1850_v10 = vsub.f32 %v1668_v25, %v774_v13 }
 0x181   :  { %1340 = vpow2.f32 %v835_v12 }
 0x182   :  { %v869_v20 = vmul.f32 1.442695, %v1850_v10  ;;  %1342 = vpow2.f32 %v867_v16  ;;  %v839_v22 = vmul.f32 1.442695, %v1847_v17 }
 0x183   :  { %v776_v21 = vpop.xlane.xlu1 %775  ;;  %v746_v18 = vpop.xlane.xlu0 %745 }
 0x184   :  { %v1855_v26 = vsub.f32 %v1681_v40, %v776_v21  ;;  %v1858_v27 = vsub.f32 %v1685_v41, %v746_v18  ;;  %1344 = vpow2.f32 %v869_v20 }
 0x185   :  { %v1335_v28 = vpop.eup %1334  ;;  %1346 = vpow2.f32 %v839_v22 }
 0x186   :  { %v841_v30 = vmul.f32 1.442695, %v1858_v27  ;;  %897 = vadd.xlane.f32.xlu0 %v1335_v28  ;;  %v871_v33 = vmul.f32 1.442695, %v1855_v26 }
 0x187   :  { %v748_v25 = vpop.xlane.xlu1 %747  ;;  %v778_v32 = vpop.xlane.xlu0 %777 }
 0x188   :  { %v1863_v34 = vsub.f32 %v1696_v50, %v748_v25  ;;  %v1866_v36 = vsub.f32 %v1692_v45, %v778_v32  ;;  %1348 = vpow2.f32 %v841_v30 }
 0x189   :  { %v1337_v40 = vpop.eup %1336  ;;  %1350 = vpow2.f32 %v871_v33 }
 0x18a   :  { %v873_v41 = vmul.f32 1.442695, %v1866_v36  ;;  %929 = vadd.xlane.f32.xlu0 %v1337_v40  ;;  %v843_v39 = vmul.f32 1.442695, %v1863_v34 }
 0x18b   :  { %v780_v37 = vpop.xlane.xlu1 %779  ;;  %v750_v38 = vpop.xlane.xlu0 %749 }
 0x18c   :  { %v1871_v42 = vsub.f32 %v1705_v62, %v780_v37  ;;  %v1874_v43 = vsub.f32 %v1709_v63, %v750_v38  ;;  %1352 = vpow2.f32 %v873_v41 }
 0x18d   :  { %v1339_v50 = vpop.eup %1338  ;;  %1354 = vpow2.f32 %v843_v39 }
 0x18e   :  { %v1341_v45 = vpop.eup %1340  ;;  %v845_v47 = vmul.f32 1.442695, %v1874_v43  ;;  %901 = vadd.xlane.f32.xlu0 %v1339_v50  ;;  %v875_v54 = vmul.f32 1.442695, %v1871_v42 }
 0x18f   :  { %899 = vadd.xlane.f32.xlu1 %v1341_v45  ;;  %v752_v53 = vpop.xlane.xlu1 %751  ;;  %v782_v58 = vpop.xlane.xlu0 %781 }
 0x190   :  { %v1879_v60 = vsub.f32 %v1720_v11, %v752_v53  ;;  %v1882_v62 = vsub.f32 %v1716_v4, %v782_v58  ;;  %v1343_v63 = vpop.eup %1342  ;;  %1356 = vpow2.f32 %v845_v47 }
 0x191   :  { %v1345_v0 = vpop.eup %1344  ;;  %1358 = vpow2.f32 %v875_v54 }
 0x192   :  { %v877_v51 = vmul.f32 1.442695, %v1882_v62  ;;  %933 = vadd.xlane.f32.xlu0 %v1345_v0  ;;  %v847_v9 = vmul.f32 1.442695, %v1879_v60  ;;  %v1347_v4 = vpop.eup %1346 }
 0x193   :  { %931 = vadd.xlane.f32.xlu1 %v1343_v63  ;;  %v784_v3 = vpop.xlane.xlu1 %783  ;;  %v754_v5 = vpop.xlane.xlu0 %753 }
 0x194   :  { %v1887_v12 = vsub.f32 %v1729_v23, %v784_v3  ;;  %v1890_v11 = vsub.f32 %v1733_v24, %v754_v5  ;;  %1360 = vpow2.f32 %v877_v51 }
 0x195   :  { %v1349_v7 = vpop.eup %1348  ;;  %1362 = vpow2.f32 %v847_v9 }
 0x196   :  { %v849_v13 = vmul.f32 1.442695, %v1890_v11  ;;  %905 = vadd.xlane.f32.xlu0 %v1349_v7  ;;  %v879_v21 = vmul.f32 1.442695, %v1887_v12  ;;  %v1351_v24 = vpop.eup %1350 }
 0x197   :  { %903 = vadd.xlane.f32.xlu1 %v1347_v4  ;;  %v756_v16 = vpop.xlane.xlu1 %755  ;;  %v786_v20 = vpop.xlane.xlu0 %785 }
 0x198   :  { %v1895_v18 = vsub.f32 %v1744_v35, %v756_v16  ;;  %v1898_v23 = vsub.f32 %v1740_v29, %v786_v20  ;;  %1364 = vpow2.f32 %v849_v13 }
 0x199   :  { %v1353_v22 = vpop.eup %1352  ;;  %1366 = vpow2.f32 %v879_v21 }
 0x19a   :  { %v881_v28 = vmul.f32 1.442695, %v1898_v23  ;;  %937 = vadd.xlane.f32.xlu0 %v1353_v22  ;;  %v851_v32 = vmul.f32 1.442695, %v1895_v18  ;;  %v1355_v29 = vpop.eup %1354 }
 0x19b   :  { %935 = vadd.xlane.f32.xlu1 %v1351_v24  ;;  %v788_v30 = vpop.xlane.xlu1 %787  ;;  %v758_v25 = vpop.xlane.xlu0 %757 }
 0x19c   :  { %v1903_v33 = vsub.f32 %v1753_v48, %v788_v30  ;;  %v1906_v35 = vsub.f32 %v1757_v49, %v758_v25  ;;  %1368 = vpow2.f32 %v881_v28 }
 0x19d   :  { %v1357_v40 = vpop.eup %1356  ;;  %1370 = vpow2.f32 %v851_v32 }
 0x19e   :  { %v853_v41 = vmul.f32 1.442695, %v1906_v35  ;;  %909 = vadd.xlane.f32.xlu0 %v1357_v40  ;;  %v883_v39 = vmul.f32 1.442695, %v1903_v33  ;;  %v1359_v49 = vpop.eup %1358 }
 0x19f   :  { %907 = vadd.xlane.f32.xlu1 %v1355_v29  ;;  %v760_v37 = vpop.xlane.xlu1 %759  ;;  %v790_v38 = vpop.xlane.xlu0 %789 }
 0x1a0   :  { %v1911_v50 = vsub.f32 %v1768_v61, %v760_v37  ;;  %v1914_v48 = vsub.f32 %v1764_v56, %v790_v38  ;;  %1372 = vpow2.f32 %v853_v41 }
 0x1a1   :  { %v1361_v45 = vpop.eup %1360  ;;  %1374 = vpow2.f32 %v883_v39 }
 0x1a2   :  { %v885_v47 = vmul.f32 1.442695, %v1914_v48  ;;  %941 = vadd.xlane.f32.xlu0 %v1361_v45  ;;  %v855_v54 = vmul.f32 1.442695, %v1911_v50  ;;  %v1363_v56 = vpop.eup %1362 }
 0x1a3   :  { %939 = vadd.xlane.f32.xlu1 %v1359_v49  ;;  %v792_v53 = vpop.xlane.xlu1 %791  ;;  %v762_v58 = vpop.xlane.xlu0 %761 }
 0x1a4   :  { %v1919_v63 = vsub.f32 %v1777_v14, %v792_v53  ;;  %v1922_v61 = vsub.f32 %v1781_v15, %v762_v58  ;;  %1376 = vpow2.f32 %v885_v47 }
 0x1a5   :  { %v1365_v0 = vpop.eup %1364  ;;  %1378 = vpow2.f32 %v855_v54 }
 0x1a6   :  { %v857_v51 = vmul.f32 1.442695, %v1922_v61  ;;  %913 = vadd.xlane.f32.xlu0 %v1365_v0  ;;  %v887_v9 = vmul.f32 1.442695, %v1919_v63  ;;  %v1367_v15 = vpop.eup %1366 }
 0x1a7   :  { %911 = vadd.xlane.f32.xlu1 %v1363_v56  ;;  %v764_v3 = vpop.xlane.xlu1 %763  ;;  %v794_v5 = vpop.xlane.xlu0 %793 }
 0x1a8   :  { %v1927_v4 = vsub.f32 %v1792_v31, %v764_v3  ;;  %v1930_v14 = vsub.f32 %v1788_v19, %v794_v5  ;;  %1380 = vpow2.f32 %v857_v51 }
 0x1a9   :  { %v1369_v7 = vpop.eup %1368  ;;  %1382 = vpow2.f32 %v887_v9 }
 0x1aa   :  { %v889_v13 = vmul.f32 1.442695, %v1930_v14  ;;  %945 = vadd.xlane.f32.xlu0 %v1369_v7  ;;  %v859_v21 = vmul.f32 1.442695, %v1927_v4  ;;  %v1371_v19 = vpop.eup %1370 }
 0x1ab   :  { %943 = vadd.xlane.f32.xlu1 %v1367_v15  ;;  %v796_v16 = vpop.xlane.xlu1 %795  ;;  %v766_v20 = vpop.xlane.xlu0 %765 }
 0x1ac   :  { %v1935_v24 = vsub.f32 %v1801_v44, %v796_v16  ;;  %v1938_v31 = vsub.f32 %v1805_v46, %v766_v20  ;;  %1384 = vpow2.f32 %v889_v13 }
 0x1ad   :  { %v1373_v22 = vpop.eup %1372  ;;  %1386 = vpow2.f32 %v859_v21 }
 0x1ae   :  { %v861_v28 = vmul.f32 1.442695, %v1938_v31  ;;  %917 = vadd.xlane.f32.xlu0 %v1373_v22  ;;  %v891_v32 = vmul.f32 1.442695, %v1935_v24  ;;  %v1375_v44 = vpop.eup %1374 }
 0x1af   :  { %915 = vadd.xlane.f32.xlu1 %v1371_v19  ;;  %v768_v30 = vpop.xlane.xlu1 %767  ;;  %v798_v25 = vpop.xlane.xlu0 %797 }
 0x1b0   :  { %v1943_v29 = vsub.f32 %v1812_v52, %v798_v25  ;;  %1388 = vpow2.f32 %v861_v28  ;;  %v1946_v46 = vsub.f32 %v1817_v55, %v768_v30 }
 0x1b1   :  { %v1377_v40 = vpop.eup %1376  ;;  %1390 = vpow2.f32 %v891_v32 }
 0x1b2   :  { %v893_v41 = vmul.f32 1.442695, %v1943_v29  ;;  %949 = vadd.xlane.f32.xlu0 %v1377_v40  ;;  %v1379_v38 = vpop.eup %1378  ;;  %v863_v39 = vmul.f32 1.442695, %v1946_v46 }
 0x1b3   :  { %947 = vadd.xlane.f32.xlu1 %v1375_v44  ;;  %v800_v37 = vpop.xlane.xlu1 %799 }
 0x1b4   :  { %1392 = vpow2.f32 %v893_v41  ;;  %v1951_v49 = vsub.f32 %v1821_v57, %v800_v37 }
 0x1b5   :  { %v1381_v52 = vpop.eup %1380  ;;  %1394 = vpow2.f32 %v863_v39 }
 0x1b6   :  { %921 = vadd.xlane.f32.xlu0 %v1381_v52  ;;  %v1383_v45 = vpop.eup %1382  ;;  %v895_v55 = vmul.f32 1.442695, %v1951_v49 }
 0x1b7   :  { %919 = vadd.xlane.f32.xlu1 %v1379_v38 }
 0x1b8   :  { %1396 = vpow2.f32 %v895_v55 }
 0x1b9   :  { %v1385_v47 = vpop.eup %1384 }
 0x1ba   :  { %953 = vadd.xlane.f32.xlu0 %v1385_v47  ;;  %v1387_v53 = vpop.eup %1386 }
 0x1bb   :  { %951 = vadd.xlane.f32.xlu1 %v1383_v45 }
 0x1bd   :  { %v1389_v58 = vpop.eup %1388 }
 0x1be   :  { %925 = vadd.xlane.f32.xlu0 %v1389_v58  ;;  %v1391_v54 = vpop.eup %1390 }
 0x1bf   :  { %923 = vadd.xlane.f32.xlu1 %v1387_v53 }
 0x1c1   :  { %v1393_v56 = vpop.eup %1392 }
 0x1c2   :  { %957 = vadd.xlane.f32.xlu0 %v1393_v56  ;;  %v1395_v57 = vpop.eup %1394 }
 0x1c3   :  { %955 = vadd.xlane.f32.xlu1 %v1391_v54 }
 0x1c5   :  { %v1397_v0 = vpop.eup %1396 }
 0x1c7   :  { %927 = vadd.xlane.f32.xlu1 %v1395_v57 }
 0x1cb   :  { %959 = vadd.xlane.f32.xlu1 %v1397_v0 }
 0x20f   :  { %v898_v51 = vpop.xlane.xlu0 %897 }
 0x210   :  { %1398 = vlog2.f32 %v898_v51 }
 0x213   :  { %v930_v3 = vpop.xlane.xlu0 %929 }
 0x214   :  { %1400 = vlog2.f32 %v930_v3 }
 0x217   :  { %v902_v9 = vpop.xlane.xlu0 %901 }
 0x218   :  { %v900_v5 = vpop.xlane.xlu1 %899 }
 0x219   :  { %1402 = vlog2.f32 %v900_v5 }
 0x21a   :  { %1404 = vlog2.f32 %v902_v9 }
 0x21b   :  { %v934_v7 = vpop.xlane.xlu0 %933 }
 0x21c   :  { %v932_v15 = vpop.xlane.xlu1 %931 }
 0x21d   :  { %v1399_v13 = vpop.eup %1398  ;;  %1406 = vlog2.f32 %v932_v15 }
 0x21e   :  { %v962_v16 = vmul.f32 0.6931472, %v1399_v13  ;;  %1408 = vlog2.f32 %v934_v7 }
 0x21f   :  { %v906_v19 = vpop.xlane.xlu0 %905 }
 0x220   :  { %v1025_v20 = vsub.f32 %v1827_v59, %v962_v16  ;;  %v904_v21 = vpop.xlane.xlu1 %903 }
 0x221   :  { %1410 = vlog2.f32 %v904_v21  ;;  %v1401_v22 = vpop.eup %1400 }
 0x222   :  { %1057 = vst [vmem:[%s2085_s3] sm:$0xff] %v1025_v20  ;;  %1412 = vlog2.f32 %v906_v19  ;;  %v994_v28 = vmul.f32 0.6931472, %v1401_v22 }
 0x223   :  { %v938_v25 = vpop.xlane.xlu0 %937 }
 0x224   :  { %v936_v30 = vpop.xlane.xlu1 %935  ;;  %v1041_v32 = vsub.f32 %v1831_v2, %v994_v28 }
 0x225   :  { %1414 = vlog2.f32 %v936_v30 }
 0x226   :  { %v1403_v44 = vpop.eup %1402  ;;  %1416 = vlog2.f32 %v938_v25  ;;  %1073 = vst [vmem:[%s2085_s3 + $0x80] sm:$0xff] %v1041_v32 }
 0x227   :  { %v1405_v40 = vpop.eup %1404  ;;  %v964_v59 = vmul.f32 0.6931472, %v1403_v44  ;;  %v910_v38 = vpop.xlane.xlu0 %909 }
 0x228   :  { %v966_v41 = vmul.f32 0.6931472, %v1405_v40  ;;  %v908_v37 = vpop.xlane.xlu1 %907 }
 0x229   :  { %v1026_v39 = vsub.f32 %v1841_v1, %v964_v59  ;;  %1418 = vlog2.f32 %v908_v37 }
 0x22a   :  { %v1407_v52 = vpop.eup %1406  ;;  %v1027_v45 = vsub.f32 %v1838_v8, %v966_v41  ;;  %1420 = vlog2.f32 %v910_v38 }
 0x22b   :  { %v1409_v2 = vpop.eup %1408  ;;  %1058 = vst [vmem:[%s2085_s3 + $0x8] sm:$0xff] %v1026_v39  ;;  %v996_v55 = vmul.f32 0.6931472, %v1407_v52  ;;  %v942_v58 = vpop.xlane.xlu0 %941 }
 0x22c   :  { %1059 = vst [vmem:[%s2085_s3 + $0x10] sm:$0xff] %v1027_v45  ;;  %v998_v47 = vmul.f32 0.6931472, %v1409_v2  ;;  %v940_v53 = vpop.xlane.xlu1 %939 }
 0x22d   :  { %v1042_v1 = vsub.f32 %v1835_v6, %v996_v55  ;;  %1422 = vlog2.f32 %v940_v53 }
 0x22e   :  { %v1411_v54 = vpop.eup %1410  ;;  %v1043_v8 = vsub.f32 %v1850_v10, %v998_v47  ;;  %1424 = vlog2.f32 %v942_v58 }
 0x22f   :  { %v1413_v56 = vpop.eup %1412  ;;  %1074 = vst [vmem:[%s2085_s3 + $0x88] sm:$0xff] %v1042_v1  ;;  %v968_v57 = vmul.f32 0.6931472, %v1411_v54  ;;  %v914_v3 = vpop.xlane.xlu0 %913 }
 0x230   :  { %1075 = vst [vmem:[%s2085_s3 + $0x90] sm:$0xff] %v1043_v8  ;;  %v970_v0 = vmul.f32 0.6931472, %v1413_v56  ;;  %v912_v51 = vpop.xlane.xlu1 %911 }
 0x231   :  { %v1028_v6 = vsub.f32 %v1847_v17, %v968_v57  ;;  %1426 = vlog2.f32 %v912_v51 }
 0x232   :  { %v1415_v5 = vpop.eup %1414  ;;  %v1029_v10 = vsub.f32 %v1858_v27, %v970_v0  ;;  %1428 = vlog2.f32 %v914_v3 }
 0x233   :  { %v1417_v9 = vpop.eup %1416  ;;  %1060 = vst [vmem:[%s2085_s3 + $0x18] sm:$0xff] %v1028_v6  ;;  %v1000_v15 = vmul.f32 0.6931472, %v1415_v5  ;;  %v946_v16 = vpop.xlane.xlu0 %945 }
 0x234   :  { %1061 = vst [vmem:[%s2085_s3 + $0x20] sm:$0xff] %v1029_v10  ;;  %v1002_v7 = vmul.f32 0.6931472, %v1417_v9  ;;  %v944_v13 = vpop.xlane.xlu1 %943 }
 0x235   :  { %v1044_v17 = vsub.f32 %v1855_v26, %v1000_v15  ;;  %1430 = vlog2.f32 %v944_v13 }
 0x236   :  { %v1419_v20 = vpop.eup %1418  ;;  %v1045_v27 = vsub.f32 %v1866_v36, %v1002_v7  ;;  %1432 = vlog2.f32 %v946_v16 }
 0x237   :  { %v1421_v21 = vpop.eup %1420  ;;  %1076 = vst [vmem:[%s2085_s3 + $0x98] sm:$0xff] %v1044_v17  ;;  %v972_v19 = vmul.f32 0.6931472, %v1419_v20  ;;  %v918_v30 = vpop.xlane.xlu0 %917 }
 0x238   :  { %1077 = vst [vmem:[%s2085_s3 + $0xa0] sm:$0xff] %v1045_v27  ;;  %v974_v22 = vmul.f32 0.6931472, %v1421_v21  ;;  %v916_v28 = vpop.xlane.xlu1 %915 }
 0x239   :  { %v1030_v26 = vsub.f32 %v1863_v34, %v972_v19  ;;  %1434 = vlog2.f32 %v916_v28 }
 0x23a   :  { %v1423_v25 = vpop.eup %1422  ;;  %v1031_v36 = vsub.f32 %v1874_v43, %v974_v22  ;;  %1436 = vlog2.f32 %v918_v30 }
 0x23b   :  { %v1425_v32 = vpop.eup %1424  ;;  %1062 = vst [vmem:[%s2085_s3 + $0x28] sm:$0xff] %v1030_v26  ;;  %v1004_v44 = vmul.f32 0.6931472, %v1423_v25  ;;  %v950_v41 = vpop.xlane.xlu0 %949 }
 0x23c   :  { %1063 = vst [vmem:[%s2085_s3 + $0x30] sm:$0xff] %v1031_v36  ;;  %v1006_v40 = vmul.f32 0.6931472, %v1425_v32  ;;  %v948_v59 = vpop.xlane.xlu1 %947 }
 0x23d   :  { %v1046_v34 = vsub.f32 %v1871_v42, %v1004_v44  ;;  %1438 = vlog2.f32 %v948_v59 }
 0x23e   :  { %v1427_v37 = vpop.eup %1426  ;;  %v1047_v43 = vsub.f32 %v1882_v62, %v1006_v40  ;;  %1440 = vlog2.f32 %v950_v41 }
 0x23f   :  { %v1429_v38 = vpop.eup %1428  ;;  %1078 = vst [vmem:[%s2085_s3 + $0xa8] sm:$0xff] %v1046_v34  ;;  %v976_v39 = vmul.f32 0.6931472, %v1427_v37  ;;  %v922_v2 = vpop.xlane.xlu0 %921 }
 0x240   :  { %1079 = vst [vmem:[%s2085_s3 + $0xb0] sm:$0xff] %v1047_v43  ;;  %v978_v52 = vmul.f32 0.6931472, %v1429_v38  ;;  %v920_v45 = vpop.xlane.xlu1 %919 }
 0x241   :  { %v1032_v42 = vsub.f32 %v1879_v60, %v976_v39  ;;  %1442 = vlog2.f32 %v920_v45 }
 0x242   :  { %v1431_v55 = vpop.eup %1430  ;;  %v1033_v62 = vsub.f32 %v1890_v11, %v978_v52  ;;  %1444 = vlog2.f32 %v922_v2 }
 0x243   :  { %v1433_v47 = vpop.eup %1432  ;;  %1064 = vst [vmem:[%s2085_s3 + $0x38] sm:$0xff] %v1032_v42  ;;  %v1008_v53 = vmul.f32 0.6931472, %v1431_v55  ;;  %v954_v54 = vpop.xlane.xlu0 %953 }
 0x244   :  { %1065 = vst [vmem:[%s2085_s3 + $0x40] sm:$0xff] %v1033_v62  ;;  %v1010_v58 = vmul.f32 0.6931472, %v1433_v47  ;;  %v952_v1 = vpop.xlane.xlu1 %951 }
 0x245   :  { %v1048_v60 = vsub.f32 %v1887_v12, %v1008_v53  ;;  %1446 = vlog2.f32 %v952_v1 }
 0x246   :  { %v1435_v8 = vpop.eup %1434  ;;  %v1049_v11 = vsub.f32 %v1898_v23, %v1010_v58  ;;  %1448 = vlog2.f32 %v954_v54 }
 0x247   :  { %v1437_v56 = vpop.eup %1436  ;;  %1080 = vst [vmem:[%s2085_s3 + $0xb8] sm:$0xff] %v1048_v60  ;;  %v980_v57 = vmul.f32 0.6931472, %v1435_v8  ;;  %v926_v3 = vpop.xlane.xlu0 %925 }
 0x248   :  { %1081 = vst [vmem:[%s2085_s3 + $0xc0] sm:$0xff] %v1049_v11  ;;  %v982_v0 = vmul.f32 0.6931472, %v1437_v56  ;;  %v924_v51 = vpop.xlane.xlu1 %923 }
 0x249   :  { %v1034_v12 = vsub.f32 %v1895_v18, %v980_v57  ;;  %1450 = vlog2.f32 %v924_v51 }
 0x24a   :  { %v1439_v6 = vpop.eup %1438  ;;  %v1035_v23 = vsub.f32 %v1906_v35, %v982_v0  ;;  %1452 = vlog2.f32 %v926_v3 }
 0x24b   :  { %v1441_v5 = vpop.eup %1440  ;;  %1066 = vst [vmem:[%s2085_s3 + $0x48] sm:$0xff] %v1034_v12  ;;  %v1012_v10 = vmul.f32 0.6931472, %v1439_v6  ;;  %v958_v7 = vpop.xlane.xlu0 %957 }
 0x24c   :  { %1067 = vst [vmem:[%s2085_s3 + $0x50] sm:$0xff] %v1035_v23  ;;  %v1014_v9 = vmul.f32 0.6931472, %v1441_v5  ;;  %v956_v15 = vpop.xlane.xlu1 %955 }
 0x24d   :  { %v1050_v18 = vsub.f32 %v1903_v33, %v1012_v10  ;;  %1454 = vlog2.f32 %v956_v15 }
 0x24e   :  { %v1443_v13 = vpop.eup %1442  ;;  %v1051_v35 = vsub.f32 %v1914_v48, %v1014_v9  ;;  %1456 = vlog2.f32 %v958_v7 }
 0x24f   :  { %v1445_v16 = vpop.eup %1444  ;;  %1082 = vst [vmem:[%s2085_s3 + $0xc8] sm:$0xff] %v1050_v18  ;;  %v984_v17 = vmul.f32 0.6931472, %v1443_v13 }
 0x250   :  { %1083 = vst [vmem:[%s2085_s3 + $0xd0] sm:$0xff] %v1051_v35  ;;  %v986_v20 = vmul.f32 0.6931472, %v1445_v16  ;;  %v928_v27 = vpop.xlane.xlu1 %927 }
 0x251   :  { %v1036_v21 = vsub.f32 %v1911_v50, %v984_v17  ;;  %1458 = vlog2.f32 %v928_v27 }
 0x252   :  { %v1447_v33 = vpop.eup %1446  ;;  %v1037_v19 = vsub.f32 %v1922_v61, %v986_v20 }
 0x253   :  { %v1449_v48 = vpop.eup %1448  ;;  %1068 = vst [vmem:[%s2085_s3 + $0x58] sm:$0xff] %v1036_v21  ;;  %v1016_v22 = vmul.f32 0.6931472, %v1447_v33 }
 0x254   :  { %1069 = vst [vmem:[%s2085_s3 + $0x60] sm:$0xff] %v1037_v19  ;;  %v1018_v28 = vmul.f32 0.6931472, %v1449_v48  ;;  %v960_v30 = vpop.xlane.xlu1 %959 }
 0x255   :  { %v1052_v26 = vsub.f32 %v1919_v63, %v1016_v22  ;;  %1460 = vlog2.f32 %v960_v30 }
 0x256   :  { %v1451_v50 = vpop.eup %1450  ;;  %v1053_v25 = vsub.f32 %v1930_v14, %v1018_v28 }
 0x257   :  { %v1453_v36 = vpop.eup %1452  ;;  %1084 = vst [vmem:[%s2085_s3 + $0xd8] sm:$0xff] %v1052_v26  ;;  %v988_v61 = vmul.f32 0.6931472, %v1451_v50 }
 0x258   :  { %1085 = vst [vmem:[%s2085_s3 + $0xe0] sm:$0xff] %v1053_v25  ;;  %v990_v32 = vmul.f32 0.6931472, %v1453_v36 }
 0x259   :  { %v1038_v44 = vsub.f32 %v1927_v4, %v988_v61 }
 0x25a   :  { %v1455_v40 = vpop.eup %1454  ;;  %v1039_v63 = vsub.f32 %v1938_v31, %v990_v32 }
 0x25b   :  { %v1457_v59 = vpop.eup %1456  ;;  %1070 = vst [vmem:[%s2085_s3 + $0x68] sm:$0xff] %v1038_v44  ;;  %v1020_v14 = vmul.f32 0.6931472, %v1455_v40 }
 0x25c   :  { %1071 = vst [vmem:[%s2085_s3 + $0x70] sm:$0xff] %v1039_v63  ;;  %v1022_v41 = vmul.f32 0.6931472, %v1457_v59 }
 0x25d   :  { %v1054_v34 = vsub.f32 %v1935_v24, %v1020_v14 }
 0x25e   :  { %v1459_v37 = vpop.eup %1458  ;;  %v1055_v43 = vsub.f32 %v1943_v29, %v1022_v41 }
 0x25f   :  { %1086 = vst [vmem:[%s2085_s3 + $0xe8] sm:$0xff] %v1054_v34  ;;  %v992_v4 = vmul.f32 0.6931472, %v1459_v37 }
 0x260   :  { %1087 = vst [vmem:[%s2085_s3 + $0xf0] sm:$0xff] %v1055_v43 }
 0x261   :  { %v1040_v31 = vsub.f32 %v1946_v46, %v992_v4 }
 0x262   :  { %v1461_v38 = vpop.eup %1460 }
 0x263   :  { %1072 = vst [vmem:[%s2085_s3 + $0x78] sm:$0xff] %v1040_v31  ;;  %v1024_v24 = vmul.f32 0.6931472, %v1461_v38 }
 0x265   :  { %v1056_v39 = vsub.f32 %v1951_v49, %v1024_v24 }
 0x267   :  { %1088 = vst [vmem:[%s2085_s3 + $0xf8] sm:$0xff] %v1056_v39 }

// kernel: _gcn_forward_padded.4
= control target key start
LH: loop header
LB: loop body
LE: loop exit
PB: predicated region body
PF: predicated region fallthrough
CT: control target
= control target key end

     0   :  { %s1926_s1 = inlined_call_operand.vmem [shape: bf16[256,128], index: 1, kind: input, shape index: {}]   ;;  %s1927_s0 = inlined_call_operand.vmem [shape: bf16[256,256], index: 0, kind: input, shape index: {}]   ;;  %s1928_s3 = inlined_call_operand.vmem [shape: bf16[128,128], index: 3, kind: input, shape index: {}]   ;;  %s1929_s2 = inlined_call_operand.vmem [shape: f32[1,128], index: 2, kind: input, shape index: {}]   ;;  %s1930_s4 = inlined_call_operand.vmem [shape: bf16[256,128], index: 4, kind: output, shape index: {}]  }
   0x1   :  { %v1558_v0 = vld [vmem:[%s1926_s1 + $0x78] sm:$0xff]   ;;  %v1560_v2 = vld [vmem:[%s1926_s1 + $0x70] sm:$0xff]   ;;  %v1562_v4 = vld [vmem:[%s1926_s1 + $0x68] sm:$0xff]  }
   0x2   :  { %v1559_v1 = vld [vmem:[%s1926_s1 + $0x38] sm:$0xff]   ;;  %1358 = vmatprep.subr.bf16.mxu0 %v1558_v0  ;;  %1542 = vmatprep.subr.bf16.mxu1 %v1558_v0  ;;  %v1561_v3 = vld [vmem:[%s1926_s1 + $0x30] sm:$0xff]   ;;  %v1563_v5 = vld [vmem:[%s1926_s1 + $0x28] sm:$0xff]  }
   0x3   :  { %1359 = vmatpush3.bf16.msra.mxu0 %v1559_v1  ;;  %1550 = vmatpush3.bf16.msra.mxu1 %v1559_v1  ;;  %v1564_v6 = vld [vmem:[%s1926_s1 + $0x60] sm:$0xff]   ;;  %v1566_v8 = vld [vmem:[%s1926_s1 + $0x58] sm:$0xff]   ;;  %v1568_v10 = vld [vmem:[%s1926_s1 + $0x50] sm:$0xff]  }
   0x4   :  { %1360 = vmatprep.subr.bf16.mxu0 %v1560_v2  ;;  %1543 = vmatprep.subr.bf16.mxu1 %v1560_v2  ;;  %v1565_v7 = vld [vmem:[%s1926_s1 + $0x20] sm:$0xff]   ;;  %v1567_v9 = vld [vmem:[%s1926_s1 + $0x18] sm:$0xff]   ;;  %v1569_v12 = vld [vmem:[%s1926_s1 + $0x10] sm:$0xff]  }
   0x5   :  { %v1576_v11 = vld [vmem:[%s1927_s0 + $0x4] ss:$8 sps:$4 sm:$0xff]   ;;  %v1574_v17 = vld [vmem:[%s1927_s0] ss:$8 sps:$4 sm:$0xff]   ;;  %v1577_v19 = vld [vmem:[%s1927_s0 + $0x14] ss:$8 sps:$4 sm:$0xff]  }
   0x6   :  { %438 = vmatprep.mubr.bf16.mxu0 %v1576_v11  ;;  %v1570_v13 = vld [vmem:[%s1926_s1 + $0x48] sm:$0xff]   ;;  %v1572_v15 = vld [vmem:[%s1926_s1 + $0x40] sm:$0xff]   ;;  %v1610_v21 = vld [vmem:[%s1927_s0 + $0xd4] ss:$8 sps:$4 sm:$0xff]  }
   0x7   :  { %1361 = vmatpush3.bf16.msra.mxu0 %v1561_v3  ;;  %1551 = vmatpush3.bf16.msra.mxu1 %v1561_v3  ;;  %v1571_v14 = vld [vmem:[%s1926_s1 + $0x8] sm:$0xff]   ;;  %v1573_v16 = vld [vmem:[%s1926_s1] sm:$0xff]   ;;  %v1579_v22 = vld [vmem:[%s1927_s0 + $0x10] ss:$8 sps:$4 sm:$0xff]  }
   0x8   :  { %1362 = vmatprep.subr.bf16.mxu0 %v1562_v4  ;;  %1544 = vmatprep.subr.bf16.mxu1 %v1562_v4  ;;  %v1606_v18 = vld [vmem:[%s1927_s0 + $0xc4] ss:$8 sps:$4 sm:$0xff]   ;;  %v1604_v20 = vld [vmem:[%s1927_s0 + $0xc0] ss:$8 sps:$4 sm:$0xff]   ;;  %v1612_v24 = vld [vmem:[%s1927_s0 + $0xd0] ss:$8 sps:$4 sm:$0xff]  }
   0x9   :  { %534 = vmatprep.mubr.bf16.mxu1 %v1606_v18  ;;  %v1580_v23 = vld [vmem:[%s1927_s0 + $0x24] ss:$8 sps:$4 sm:$0xff]   ;;  %v1622_v26 = vld [vmem:[%s1928_s3 + $0x38] sm:$0xff]   ;;  %v1623_v27 = vld [vmem:[%s1928_s3 + $0x30] sm:$0xff]  }
   0xa   :  { %v1616_v25 = vld [vmem:[%s1927_s0 + $0xe4] ss:$8 sps:$4 sm:$0xff]   ;;  %v1582_v29 = vld [vmem:[%s1927_s0 + $0x20] ss:$8 sps:$4 sm:$0xff]   ;;  %v1583_v30 = vld [vmem:[%s1927_s0 + $0x34] ss:$8 sps:$4 sm:$0xff]  }
   0xb   :  { %1363 = vmatpush3.bf16.msra.mxu0 %v1563_v5  ;;  %1552 = vmatpush3.bf16.msra.mxu1 %v1563_v5  ;;  %v1624_v28 = vld [vmem:[%s1928_s3 + $0x28] sm:$0xff]   ;;  %v1619_v32 = vld [vmem:[%s1927_s0 + $0xf4] ss:$8 sps:$4 sm:$0xff]   ;;  %v1585_v33 = vld [vmem:[%s1927_s0 + $0x30] ss:$8 sps:$4 sm:$0xff]  }
   0xc   :  { %1364 = vmatprep.subr.bf16.mxu0 %v1564_v6  ;;  %1545 = vmatprep.subr.bf16.mxu1 %v1564_v6  ;;  %v1618_v31 = vld [vmem:[%s1927_s0 + $0xe0] ss:$8 sps:$4 sm:$0xff]   ;;  %v1586_v34 = vld [vmem:[%s1927_s0 + $0x44] ss:$8 sps:$4 sm:$0xff]   ;;  %v1621_v35 = vld [vmem:[%s1927_s0 + $0xf0] ss:$8 sps:$4 sm:$0xff]  }
   0xd   :  { %v1588_v36 = vld [vmem:[%s1927_s0 + $0x40] ss:$8 sps:$4 sm:$0xff]   ;;  %v1589_v37 = vld [vmem:[%s1927_s0 + $0x54] ss:$8 sps:$4 sm:$0xff]   ;;  %v1591_v38 = vld [vmem:[%s1927_s0 + $0x50] ss:$8 sps:$4 sm:$0xff]  }
   0xe   :  { %v1592_v39 = vld [vmem:[%s1927_s0 + $0x64] ss:$8 sps:$4 sm:$0xff]   ;;  %v1594_v40 = vld [vmem:[%s1927_s0 + $0x60] ss:$8 sps:$4 sm:$0xff]   ;;  %v1595_v41 = vld [vmem:[%s1927_s0 + $0x74] ss:$8 sps:$4 sm:$0xff]  }
   0xf   :  { %1365 = vmatpush3.bf16.msra.mxu0 %v1565_v7  ;;  %1553 = vmatpush3.bf16.msra.mxu1 %v1565_v7  ;;  %v1597_v42 = vld [vmem:[%s1927_s0 + $0x70] ss:$8 sps:$4 sm:$0xff]   ;;  %v1598_v43 = vld [vmem:[%s1927_s0 + $0x84] ss:$8 sps:$4 sm:$0xff]   ;;  %v1600_v44 = vld [vmem:[%s1927_s0 + $0x80] ss:$8 sps:$4 sm:$0xff]  }
  0x10   :  { %1366 = vmatprep.subr.bf16.mxu0 %v1566_v8  ;;  %1546 = vmatprep.subr.bf16.mxu1 %v1566_v8  ;;  %v1601_v45 = vld [vmem:[%s1927_s0 + $0x94] ss:$8 sps:$4 sm:$0xff]   ;;  %v1625_v46 = vld [vmem:[%s1928_s3 + $0x20] sm:$0xff]   ;;  %v1603_v47 = vld [vmem:[%s1927_s0 + $0x90] ss:$8 sps:$4 sm:$0xff]  }
  0x11   :  { %v1607_v48 = vld [vmem:[%s1927_s0 + $0xa4] ss:$8 sps:$4 sm:$0xff]   ;;  %v1626_v49 = vld [vmem:[%s1928_s3 + $0x18] sm:$0xff]   ;;  %v1627_v50 = vld [vmem:[%s1928_s3 + $0x10] sm:$0xff]  }
  0x12   :  { %v1609_v51 = vld [vmem:[%s1927_s0 + $0xa0] ss:$8 sps:$4 sm:$0xff]   ;;  %v1613_v52 = vld [vmem:[%s1927_s0 + $0xb4] ss:$8 sps:$4 sm:$0xff]   ;;  %v1615_v55 = vld [vmem:[%s1927_s0 + $0xb0] ss:$8 sps:$4 sm:$0xff]  }
  0x13   :  { %1367 = vmatpush3.bf16.msra.mxu0 %v1567_v9  ;;  %1554 = vmatpush3.bf16.msra.mxu1 %v1567_v9  ;;  %v1628_v53 = vld [vmem:[%s1928_s3 + $0x8] sm:$0xff]   ;;  %v1629_v54 = vld [vmem:[%s1928_s3] sm:$0xff]  }
  0x14   :  { %1368 = vmatprep.subr.bf16.mxu0 %v1568_v10  ;;  %1547 = vmatprep.subr.bf16.mxu1 %v1568_v10  ;;  %v1826_v59 = vld [vmem:[%s1929_s2] ss:$0 sm:$0xff] }
  0x17   :  { %1369 = vmatpush3.bf16.msra.mxu0 %v1569_v12  ;;  %1555 = vmatpush3.bf16.msra.mxu1 %v1569_v12 }
  0x18   :  { %1370 = vmatprep.subr.bf16.mxu0 %v1570_v13  ;;  %1548 = vmatprep.subr.bf16.mxu1 %v1570_v13 }
  0x1b   :  { %1371 = vmatpush3.bf16.msra.mxu0 %v1571_v14  ;;  %1556 = vmatpush3.bf16.msra.mxu1 %v1571_v14 }
  0x1c   :  { %1372 = vmatprep.subr.bf16.mxu0 %v1572_v15  ;;  %1549 = vmatprep.subr.bf16.mxu1 %v1572_v15 }
  0x1f   :  { %1373 = vmatpush3.bf16.msra.mxu0 %v1573_v16  ;;  %1557 = vmatpush3.bf16.msra.mxu1 %v1573_v16 }
  0x20   :  { %1494 = vmatprep.subr.bf16.mxu1 %v1622_v26 }
  0x22   :  { %439 = vmatmul.mubr.bf16.vlgmr.msra.gmra.mxu0 %v1574_v17  ;;  %535 = vmatmul.mubr.bf16.vlgmr.msra.gmra.mxu1 %v1604_v20 }
  0x23   :  { %446 = vmatprep.mubr.bf16.mxu0 %v1577_v19  ;;  %542 = vmatprep.mubr.bf16.mxu1 %v1610_v21 }
  0x24   :  { %1495 = vmatpush3.bf16.msra.mxu1 %v1622_v26 }
  0x25   :  { %1496 = vmatprep.subr.bf16.mxu1 %v1623_v27 }
  0x28   :  { %1497 = vmatpush3.bf16.msra.mxu1 %v1623_v27 }
  0x29   :  { %1498 = vmatprep.subr.bf16.mxu1 %v1624_v28 }
  0x2a   :  { %447 = vmatmul.mubr.bf16.gmra.mxu0 %v1579_v22  ;;  %543 = vmatmul.mubr.bf16.gmra.mxu1 %v1612_v24 }
  0x2b   :  { %454 = vmatprep.mubr.bf16.mxu0 %v1580_v23  ;;  %550 = vmatprep.mubr.bf16.mxu1 %v1616_v25 }
  0x2c   :  { %1499 = vmatpush3.bf16.msra.mxu1 %v1624_v28 }
  0x2d   :  { %1500 = vmatprep.subr.bf16.mxu1 %v1625_v46 }
  0x30   :  { %1501 = vmatpush3.bf16.msra.mxu1 %v1625_v46 }
  0x31   :  { %1502 = vmatprep.subr.bf16.mxu1 %v1626_v49 }
  0x32   :  { %455 = vmatmul.mubr.bf16.gmra.mxu0 %v1582_v29  ;;  %551 = vmatmul.mubr.bf16.gmra.mxu1 %v1618_v31 }
  0x33   :  { %462 = vmatprep.mubr.bf16.mxu0 %v1583_v30  ;;  %558 = vmatprep.mubr.bf16.mxu1 %v1619_v32 }
  0x34   :  { %1503 = vmatpush3.bf16.msra.mxu1 %v1626_v49 }
  0x35   :  { %1504 = vmatprep.subr.bf16.mxu1 %v1627_v50 }
  0x38   :  { %1505 = vmatpush3.bf16.msra.mxu1 %v1627_v50 }
  0x39   :  { %1506 = vmatprep.subr.bf16.mxu1 %v1628_v53 }
  0x3a   :  { %463 = vmatmul.mubr.bf16.gmra.mxu0 %v1585_v33  ;;  %559 = vmatmul.mubr.bf16.gmra.mxu1 %v1621_v35 }
  0x3b   :  { %470 = vmatprep.mubr.bf16.mxu0 %v1586_v34 }
  0x3c   :  { %1507 = vmatpush3.bf16.msra.mxu1 %v1628_v53 }
  0x3d   :  { %1508 = vmatprep.subr.bf16.mxu1 %v1629_v54 }
  0x40   :  { %1509 = vmatpush3.bf16.msra.mxu1 %v1629_v54 }
  0x42   :  { %471 = vmatmul.mubr.bf16.gmra.mxu0 %v1588_v36 }
  0x43   :  { %478 = vmatprep.mubr.bf16.mxu0 %v1589_v37 }
  0x4a   :  { %479 = vmatmul.mubr.bf16.gmra.mxu0 %v1591_v38 }
  0x4b   :  { %486 = vmatprep.mubr.bf16.mxu0 %v1592_v39 }
  0x52   :  { %487 = vmatmul.mubr.bf16.gmra.mxu0 %v1594_v40 }
  0x53   :  { %494 = vmatprep.mubr.bf16.mxu0 %v1595_v41 }
  0x5a   :  { %495 = vmatmul.mubr.bf16.gmra.mxu0 %v1597_v42 }
  0x5b   :  { %502 = vmatprep.mubr.bf16.mxu0 %v1598_v43 }
  0x62   :  { %503 = vmatmul.mubr.bf16.gmra.mxu0 %v1600_v44 }
  0x63   :  { %510 = vmatprep.mubr.bf16.mxu0 %v1601_v45 }
  0x6a   :  { %511 = vmatmul.mubr.bf16.gmra.mxu0 %v1603_v47 }
  0x6b   :  { %518 = vmatprep.mubr.bf16.mxu0 %v1607_v48 }
  0x72   :  { %519 = vmatmul.mubr.bf16.gmra.mxu0 %v1609_v51 }
  0x73   :  { %526 = vmatprep.mubr.bf16.mxu0 %v1613_v52 }
  0x7a   :  { %527 = vmatmul.mubr.bf16.gmra.mxu0 %v1615_v55 }
  0xe2   :  { %v1374_v56 = vpop.f32.mrf.mxu0  ;;  %v1838_v47 = vpop.f32.mrf.mxu1 }
  0xe4   :  { %v1375_v57 = vpop.f32.mrf.mxu0  ;;  %v1840_v54 = vpop.f32.mrf.mxu1 }
  0xe5   :  { %v1376_v58 = vadd.f32 %v1375_v57, %v1374_v56 }
  0xe6   :  { %v1377_v60 = vpop.f32.mrf.mxu0 }
  0xe7   :  { %v673_v62 = vadd.f32 %v1376_v58, %v1826_v59 }
  0xe8   :  { %v1378_v61 = vpop.f32.mrf.mxu0 }
  0xe9   :  { %v1379_v63 = vadd.f32 %v1378_v61, %v1377_v60  ;;  %v705_v3 = vmax.f32 %v673_v62, 0.0  ;;  %v1844_v61 = vpop.f32.mrf.mxu1 }
  0xea   :  { %v1380_v0 = vpop.f32.mrf.mxu0 }
  0xeb   :  { %v674_v1 = vadd.f32 %v1379_v63, %v1826_v59 }
  0xec   :  { %v1381_v2 = vpop.f32.mrf.mxu0 }
  0xed   :  { %v706_v4 = vmax.f32 %v674_v1, 0.0  ;;  %v1382_v5 = vadd.f32 %v1381_v2, %v1380_v0 }
  0xee   :  { %v1383_v6 = vpop.f32.mrf.mxu0 }
  0xef   :  { %v737_v7 = vpack.c.bf16 %v706_v4, %v705_v3  ;;  %v675_v9 = vadd.f32 %v1382_v5, %v1826_v59  ;;  %v1846_v4 = vpop.f32.mrf.mxu1 }
  0xf0   :  { %v1384_v8 = vpop.f32.mrf.mxu0 }
  0xf1   :  { %v1385_v10 = vadd.f32 %v1384_v8, %v1383_v6  ;;  %1510 = vmatprep.mubr.bf16.mxu1 %v737_v7  ;;  %v707_v14 = vmax.f32 %v675_v9, 0.0 }
  0xf2   :  { %v1386_v11 = vpop.f32.mrf.mxu0 }
  0xf3   :  { %v676_v12 = vadd.f32 %v1385_v10, %v1826_v59  ;;  %v1850_v10 = vpop.f32.mrf.mxu1 }
  0xf4   :  { %v1387_v13 = vpop.f32.mrf.mxu0 }
  0xf5   :  { %v708_v15 = vmax.f32 %v676_v12, 0.0  ;;  %v1388_v16 = vadd.f32 %v1387_v13, %v1386_v11 }
  0xf6   :  { %v1389_v17 = vpop.f32.mrf.mxu0 }
  0xf7   :  { %v738_v18 = vpack.c.bf16 %v708_v15, %v707_v14  ;;  %v677_v20 = vadd.f32 %v1388_v16, %v1826_v59 }
  0xf8   :  { %v1390_v19 = vpop.f32.mrf.mxu0 }
  0xf9   :  { %v1391_v21 = vadd.f32 %v1390_v19, %v1389_v17  ;;  %1511 = vmatmul.mubr.bf16.vlgmr.msra.gmra.mxu1 %v738_v18  ;;  %v709_v25 = vmax.f32 %v677_v20, 0.0  ;;  %v1852_v17 = vpop.f32.mrf.mxu1 }
  0xfa   :  { %v1392_v22 = vpop.f32.mrf.mxu0 }
  0xfb   :  { %v678_v23 = vadd.f32 %v1391_v21, %v1826_v59 }
  0xfc   :  { %v1393_v24 = vpop.f32.mrf.mxu0 }
  0xfd   :  { %v710_v26 = vmax.f32 %v678_v23, 0.0  ;;  %v1394_v27 = vadd.f32 %v1393_v24, %v1392_v22  ;;  %v1455_v23 = vpop.f32.mrf.mxu1 }
  0xfe   :  { %v1395_v28 = vpop.f32.mrf.mxu0 }
  0xff   :  { %v739_v29 = vpack.c.bf16 %v710_v26, %v709_v25  ;;  %v679_v31 = vadd.f32 %v1394_v27, %v1826_v59 }
 0x100   :  { %v1396_v30 = vpop.f32.mrf.mxu0 }
 0x101   :  { %v1397_v32 = vadd.f32 %v1396_v30, %v1395_v28  ;;  %1514 = vmatprep.mubr.bf16.mxu1 %v739_v29  ;;  %v711_v36 = vmax.f32 %v679_v31, 0.0  ;;  %v1456_v30 = vpop.f32.mrf.mxu1 }
 0x102   :  { %v1398_v33 = vpop.f32.mrf.mxu0 }
 0x103   :  { %v680_v34 = vadd.f32 %v1397_v32, %v1826_v59 }
 0x104   :  { %v1399_v35 = vpop.f32.mrf.mxu0 }
 0x105   :  { %v712_v37 = vmax.f32 %v680_v34, 0.0  ;;  %v1400_v38 = vadd.f32 %v1399_v35, %v1398_v33 }
 0x106   :  { %v1401_v39 = vpop.f32.mrf.mxu0 }
 0x107   :  { %v740_v40 = vpack.c.bf16 %v712_v37, %v711_v36  ;;  %v681_v42 = vadd.f32 %v1400_v38, %v1826_v59  ;;  %v1458_v36 = vpop.f32.mrf.mxu1 }
 0x108   :  { %v1402_v41 = vpop.f32.mrf.mxu0 }
 0x109   :  { %v1403_v43 = vadd.f32 %v1402_v41, %v1401_v39  ;;  %1515 = vmatmul.mubr.bf16.gmra.mxu1 %v740_v40  ;;  %v713_v48 = vmax.f32 %v681_v42, 0.0 }
 0x10a   :  { %v1404_v44 = vpop.f32.mrf.mxu0 }
 0x10b   :  { %v682_v45 = vadd.f32 %v1403_v43, %v1826_v59  ;;  %v1459_v43 = vpop.f32.mrf.mxu1 }
 0x10c   :  { %v1405_v46 = vpop.f32.mrf.mxu0 }
 0x10d   :  { %v714_v49 = vmax.f32 %v682_v45, 0.0  ;;  %v1406_v50 = vadd.f32 %v1405_v46, %v1404_v44 }
 0x10e   :  { %v1407_v51 = vpop.f32.mrf.mxu0 }
 0x10f   :  { %v741_v52 = vpack.c.bf16 %v714_v49, %v713_v48  ;;  %v683_v55 = vadd.f32 %v1406_v50, %v1826_v59  ;;  %v1461_v50 = vpop.f32.mrf.mxu1 }
 0x110   :  { %v1408_v53 = vpop.f32.mrf.mxu0 }
 0x111   :  { %v1409_v56 = vadd.f32 %v1408_v53, %v1407_v51  ;;  %1518 = vmatprep.mubr.bf16.mxu1 %v741_v52  ;;  %v715_v62 = vmax.f32 %v683_v55, 0.0 }
 0x112   :  { %v1410_v57 = vpop.f32.mrf.mxu0 }
 0x113   :  { %v684_v58 = vadd.f32 %v1409_v56, %v1826_v59 }
 0x114   :  { %v1411_v60 = vpop.f32.mrf.mxu0 }
 0x115   :  { %v716_v63 = vmax.f32 %v684_v58, 0.0  ;;  %v1412_v0 = vadd.f32 %v1411_v60, %v1410_v57  ;;  %v1462_v58 = vpop.f32.mrf.mxu1 }
 0x116   :  { %v1413_v1 = vpop.f32.mrf.mxu0 }
 0x117   :  { %v742_v2 = vpack.c.bf16 %v716_v63, %v715_v62  ;;  %v685_v5 = vadd.f32 %v1412_v0, %v1826_v59 }
 0x118   :  { %v1414_v3 = vpop.f32.mrf.mxu0 }
 0x119   :  { %v1415_v6 = vadd.f32 %v1414_v3, %v1413_v1  ;;  %1519 = vmatmul.mubr.bf16.gmra.mxu1 %v742_v2  ;;  %v717_v11 = vmax.f32 %v685_v5, 0.0  ;;  %v1448_v1 = vadd.f32 %v1840_v54, %v1838_v47  ;;  %v1451_v2 = vadd.f32 %v1846_v4, %v1844_v61  ;;  %v1464_v5 = vpop.f32.mrf.mxu1 }
 0x11a   :  { %v1416_v7 = vpop.f32.mrf.mxu0  ;;  %v1454_v47 = vadd.f32 %v1852_v17, %v1850_v10  ;;  %v1457_v54 = vadd.f32 %v1456_v30, %v1455_v23 }
 0x11b   :  { %v686_v8 = vadd.f32 %v1415_v6, %v1826_v59 }
 0x11c   :  { %v1417_v9 = vpop.f32.mrf.mxu0 }
 0x11d   :  { %v718_v12 = vmax.f32 %v686_v8, 0.0  ;;  %v1418_v13 = vadd.f32 %v1417_v9, %v1416_v7 }
 0x11e   :  { %v1419_v14 = vpop.f32.mrf.mxu0 }
 0x11f   :  { %v743_v15 = vpack.c.bf16 %v718_v12, %v717_v11  ;;  %v687_v18 = vadd.f32 %v1418_v13, %v1826_v59  ;;  %v697_v12 = vadd.f32 %v1448_v1, %v1826_v59  ;;  %v698_v13 = vadd.f32 %v1451_v2, %v1826_v59 }
 0x120   :  { %v1420_v16 = vpop.f32.mrf.mxu0 }
 0x121   :  { %v1421_v19 = vadd.f32 %v1420_v16, %v1419_v14  ;;  %1522 = vmatprep.mubr.bf16.mxu1 %v743_v15  ;;  %v719_v24 = vmax.f32 %v687_v18, 0.0  ;;  %v1465_v15 = vpop.f32.mrf.mxu1  ;;  %v729_v4 = vmax.f32 %v697_v12, 0.0 }
 0x122   :  { %v1422_v20 = vpop.f32.mrf.mxu0 }
 0x123   :  { %v688_v21 = vadd.f32 %v1421_v19, %v1826_v59  ;;  %v730_v19 = vmax.f32 %v698_v13, 0.0 }
 0x124   :  { %v1423_v22 = vpop.f32.mrf.mxu0 }
 0x125   :  { %v720_v25 = vmax.f32 %v688_v21, 0.0  ;;  %v1424_v26 = vadd.f32 %v1423_v22, %v1422_v20  ;;  %v1460_v20 = vadd.f32 %v1459_v43, %v1458_v36  ;;  %v1463_v21 = vadd.f32 %v1462_v58, %v1461_v50  ;;  %v1467_v22 = vpop.f32.mrf.mxu1 }
 0x126   :  { %v1425_v27 = vpop.f32.mrf.mxu0  ;;  %v749_v17 = vpack.c.bf16 %v730_v19, %v729_v4 }
 0x127   :  { %v744_v28 = vpack.c.bf16 %v720_v25, %v719_v24  ;;  %v689_v31 = vadd.f32 %v1424_v26, %v1826_v59  ;;  %v699_v26 = vadd.f32 %v1454_v47, %v1826_v59  ;;  %v1468_v10 = vpop.f32.mrf.mxu1 }
 0x128   :  { %v1426_v29 = vpop.f32.mrf.mxu0 }
 0x129   :  { %v1427_v32 = vadd.f32 %v1426_v29, %v1425_v27  ;;  %1523 = vmatmul.mubr.bf16.gmra.mxu1 %v744_v28  ;;  %v721_v37 = vmax.f32 %v689_v31, 0.0  ;;  %v700_v27 = vadd.f32 %v1457_v54, %v1826_v59  ;;  %v701_v29 = vadd.f32 %v1460_v20, %v1826_v59 }
 0x12a   :  { %v1428_v33 = vpop.f32.mrf.mxu0  ;;  %v702_v31 = vadd.f32 %v1463_v21, %v1826_v59  ;;  %v731_v23 = vmax.f32 %v699_v26, 0.0 }
 0x12b   :  { %v690_v34 = vadd.f32 %v1427_v32, %v1826_v59  ;;  %v732_v30 = vmax.f32 %v700_v27, 0.0  ;;  %v1466_v32 = vadd.f32 %v1465_v15, %v1464_v5 }
 0x12c   :  { %v1429_v35 = vpop.f32.mrf.mxu0 }
 0x12d   :  { %v722_v38 = vmax.f32 %v690_v34, 0.0  ;;  %v1430_v39 = vadd.f32 %v1429_v35, %v1428_v33  ;;  %v1469_v33 = vadd.f32 %v1468_v10, %v1467_v22  ;;  %v733_v34 = vmax.f32 %v701_v29, 0.0 }
 0x12e   :  { %v1431_v40 = vpop.f32.mrf.mxu0  ;;  %v734_v35 = vmax.f32 %v702_v31, 0.0  ;;  %v703_v36 = vadd.f32 %v1466_v32, %v1826_v59 }
 0x12f   :  { %v745_v41 = vpack.c.bf16 %v722_v38, %v721_v37  ;;  %v691_v44 = vadd.f32 %v1430_v39, %v1826_v59  ;;  %v704_v37 = vadd.f32 %v1469_v33, %v1826_v59  ;;  %v750_v38 = vpack.c.bf16 %v732_v30, %v731_v23 }
 0x130   :  { %v1432_v42 = vpop.f32.mrf.mxu0  ;;  %v751_v39 = vpack.c.bf16 %v734_v35, %v733_v34 }
 0x131   :  { %v1433_v45 = vadd.f32 %v1432_v42, %v1431_v40  ;;  %1526 = vmatprep.mubr.bf16.mxu1 %v745_v41  ;;  %v723_v51 = vmax.f32 %v691_v44, 0.0  ;;  %v735_v40 = vmax.f32 %v703_v36, 0.0  ;;  %v736_v41 = vmax.f32 %v704_v37, 0.0 }
 0x132   :  { %v1434_v46 = vpop.f32.mrf.mxu0 }
 0x133   :  { %v692_v48 = vadd.f32 %v1433_v45, %v1826_v59  ;;  %v752_v42 = vpack.c.bf16 %v736_v41, %v735_v40 }
 0x134   :  { %v1435_v49 = vpop.f32.mrf.mxu0 }
 0x135   :  { %v724_v52 = vmax.f32 %v692_v48, 0.0  ;;  %v1436_v53 = vadd.f32 %v1435_v49, %v1434_v46 }
 0x136   :  { %v1437_v55 = vpop.f32.mrf.mxu0 }
 0x137   :  { %v746_v56 = vpack.c.bf16 %v724_v52, %v723_v51  ;;  %v693_v60 = vadd.f32 %v1436_v53, %v1826_v59 }
 0x138   :  { %v1438_v57 = vpop.f32.mrf.mxu0 }
 0x139   :  { %v1439_v62 = vadd.f32 %v1438_v57, %v1437_v55  ;;  %1527 = vmatmul.mubr.bf16.gmra.mxu1 %v746_v56  ;;  %v725_v6 = vmax.f32 %v693_v60, 0.0 }
 0x13a   :  { %v1440_v63 = vpop.f32.mrf.mxu0 }
 0x13b   :  { %v694_v0 = vadd.f32 %v1439_v62, %v1826_v59 }
 0x13c   :  { %v1441_v3 = vpop.f32.mrf.mxu0 }
 0x13d   :  { %v726_v7 = vmax.f32 %v694_v0, 0.0  ;;  %v1442_v8 = vadd.f32 %v1441_v3, %v1440_v63 }
 0x13e   :  { %v1443_v9 = vpop.f32.mrf.mxu0 }
 0x13f   :  { %v747_v11 = vpack.c.bf16 %v726_v7, %v725_v6  ;;  %v695_v16 = vadd.f32 %v1442_v8, %v1826_v59 }
 0x140   :  { %v1444_v14 = vpop.f32.mrf.mxu0 }
 0x141   :  { %v1445_v18 = vadd.f32 %v1444_v14, %v1443_v9  ;;  %1530 = vmatprep.mubr.bf16.mxu1 %v747_v11  ;;  %v727_v24 = vmax.f32 %v695_v16, 0.0 }
 0x143   :  { %v696_v61 = vadd.f32 %v1445_v18, %v1826_v59 }
 0x145   :  { %v728_v25 = vmax.f32 %v696_v61, 0.0 }
 0x147   :  { %v748_v28 = vpack.c.bf16 %v728_v25, %v727_v24 }
 0x149   :  { %1531 = vmatmul.mubr.bf16.gmra.mxu1 %v748_v28 }
 0x14a   :  { %1534 = vmatprep.mubr.bf16.mxu1 %v749_v17 }
 0x151   :  { %1535 = vmatmul.mubr.bf16.gmra.mxu1 %v750_v38 }
 0x152   :  { %1538 = vmatprep.mubr.bf16.mxu1 %v751_v39 }
 0x159   :  { %1539 = vmatmul.mubr.bf16.gmra.mxu1 %v752_v42 }
 0x1b9   :  { %v1512_v43 = vpop.f32.mrf.mxu1 }
 0x1bb   :  { %v851_v44 = vpop.f32.mrf.mxu1 }
 0x1bd   :  { %v1513_v45 = vpop.f32.mrf.mxu1 }
 0x1be   :  { %v1271_v46 = vpack.c.bf16 %v1513_v45, %v1512_v43 }
 0x1bf   :  { %v854_v48 = vpop.f32.mrf.mxu1 }
 0x1c0   :  { %1343 = vst [vmem:[%s1930_s4 + $0x8] sm:$0xff] %v1271_v46   ;;  %v1266_v49 = vpack.c.bf16 %v854_v48, %v851_v44 }
 0x1c2   :  { %1267 = vst [vmem:[%s1930_s4] sm:$0xff] %v1266_v49  }
 0x1c9   :  { %v1516_v59 = vpop.f32.mrf.mxu1 }
 0x1cb   :  { %v867_v50 = vpop.f32.mrf.mxu1 }
 0x1cd   :  { %v1517_v51 = vpop.f32.mrf.mxu1 }
 0x1ce   :  { %v1281_v52 = vpack.c.bf16 %v1517_v51, %v1516_v59 }
 0x1cf   :  { %v870_v53 = vpop.f32.mrf.mxu1 }
 0x1d0   :  { %1345 = vst [vmem:[%s1930_s4 + $0x18] sm:$0xff] %v1281_v52   ;;  %v1276_v55 = vpack.c.bf16 %v870_v53, %v867_v50 }
 0x1d2   :  { %1344 = vst [vmem:[%s1930_s4 + $0x10] sm:$0xff] %v1276_v55  }
 0x1d9   :  { %v1520_v56 = vpop.f32.mrf.mxu1 }
 0x1db   :  { %v883_v57 = vpop.f32.mrf.mxu1 }
 0x1dd   :  { %v1521_v58 = vpop.f32.mrf.mxu1 }
 0x1de   :  { %v1291_v60 = vpack.c.bf16 %v1521_v58, %v1520_v56 }
 0x1df   :  { %v886_v62 = vpop.f32.mrf.mxu1 }
 0x1e0   :  { %1347 = vst [vmem:[%s1930_s4 + $0x28] sm:$0xff] %v1291_v60   ;;  %v1286_v63 = vpack.c.bf16 %v886_v62, %v883_v57 }
 0x1e2   :  { %1346 = vst [vmem:[%s1930_s4 + $0x20] sm:$0xff] %v1286_v63  }
 0x1e9   :  { %v1524_v0 = vpop.f32.mrf.mxu1 }
 0x1eb   :  { %v899_v1 = vpop.f32.mrf.mxu1 }
 0x1ed   :  { %v1525_v2 = vpop.f32.mrf.mxu1 }
 0x1ee   :  { %v1301_v3 = vpack.c.bf16 %v1525_v2, %v1524_v0 }
 0x1ef   :  { %v902_v5 = vpop.f32.mrf.mxu1 }
 0x1f0   :  { %1349 = vst [vmem:[%s1930_s4 + $0x38] sm:$0xff] %v1301_v3   ;;  %v1296_v6 = vpack.c.bf16 %v902_v5, %v899_v1 }
 0x1f2   :  { %1348 = vst [vmem:[%s1930_s4 + $0x30] sm:$0xff] %v1296_v6  }
 0x1f9   :  { %v1528_v7 = vpop.f32.mrf.mxu1 }
 0x1fb   :  { %v915_v8 = vpop.f32.mrf.mxu1 }
 0x1fd   :  { %v1529_v9 = vpop.f32.mrf.mxu1 }
 0x1fe   :  { %v1311_v11 = vpack.c.bf16 %v1529_v9, %v1528_v7 }
 0x1ff   :  { %v918_v12 = vpop.f32.mrf.mxu1 }
 0x200   :  { %1351 = vst [vmem:[%s1930_s4 + $0x48] sm:$0xff] %v1311_v11   ;;  %v1306_v13 = vpack.c.bf16 %v918_v12, %v915_v8 }
 0x202   :  { %1350 = vst [vmem:[%s1930_s4 + $0x40] sm:$0xff] %v1306_v13  }
 0x209   :  { %v1532_v14 = vpop.f32.mrf.mxu1 }
 0x20b   :  { %v931_v15 = vpop.f32.mrf.mxu1 }
 0x20d   :  { %v1533_v16 = vpop.f32.mrf.mxu1 }
 0x20e   :  { %v1321_v18 = vpack.c.bf16 %v1533_v16, %v1532_v14 }
 0x20f   :  { %v934_v47 = vpop.f32.mrf.mxu1 }
 0x210   :  { %1353 = vst [vmem:[%s1930_s4 + $0x58] sm:$0xff] %v1321_v18   ;;  %v1316_v54 = vpack.c.bf16 %v934_v47, %v931_v15 }
 0x211   :  { %v1536_v61 = vpop.f32.mrf.mxu1 }
 0x212   :  { %1352 = vst [vmem:[%s1930_s4 + $0x50] sm:$0xff] %v1316_v54  }
 0x213   :  { %v947_v4 = vpop.f32.mrf.mxu1 }
 0x215   :  { %v1537_v19 = vpop.f32.mrf.mxu1 }
 0x216   :  { %v1331_v20 = vpack.c.bf16 %v1537_v19, %v1536_v61 }
 0x217   :  { %v950_v21 = vpop.f32.mrf.mxu1 }
 0x218   :  { %1355 = vst [vmem:[%s1930_s4 + $0x68] sm:$0xff] %v1331_v20   ;;  %v1326_v22 = vpack.c.bf16 %v950_v21, %v947_v4 }
 0x219   :  { %v1540_v24 = vpop.f32.mrf.mxu1 }
 0x21a   :  { %1354 = vst [vmem:[%s1930_s4 + $0x60] sm:$0xff] %v1326_v22  }
 0x21b   :  { %v963_v25 = vpop.f32.mrf.mxu1 }
 0x21d   :  { %v1541_v26 = vpop.f32.mrf.mxu1 }
 0x21e   :  { %v1341_v27 = vpack.c.bf16 %v1541_v26, %v1540_v24 }
 0x21f   :  { %v966_v28 = vpop.f32.mrf.mxu1 }
 0x220   :  { %1357 = vst [vmem:[%s1930_s4 + $0x78] sm:$0xff] %v1341_v27   ;;  %v1336_v29 = vpack.c.bf16 %v966_v28, %v963_v25 }
 0x222   :  { %1356 = vst [vmem:[%s1930_s4 + $0x70] sm:$0xff] %v1336_v29  }

</bundles_post_ra>
